<compile_context>
chip_gen: v7x
topology: tpu7x:2x2x1
jax: 0.10.0
libtpu: 0.0.40
codegen_flags: <defaults>
</compile_context>

<pallas_src>
import functools

import numpy as np
import jax
import jax.numpy as jnp
from jax.experimental import pallas as pl
from jax.experimental.pallas import tpu as pltpu

_EPS = 1e-6          # torch.nn.functional.normalize eps
_MIN_ANGLE = 1e-3    # clamp used in the forward pass
_F32_MAX = float(np.finfo(np.float32).max)


def _normalize3(v):
    """torch F.normalize along the 3-row axis: x / max(||x||, eps)."""
    s = jnp.sum(v * v, axis=0, keepdims=True)
    return v * jax.lax.rsqrt(jnp.maximum(s, _EPS * _EPS))


def _g_term(cos_theta, cos_theta_v, alpha_sq, recip):
    """GGX geometric term from precomputed cosines.  All args (1,T)/(L,T)."""
    # chi^+ via sign product: identical to torch's nan_to_num'd ratio except
    # on the measure-zero set cos_theta_v == 0.
    chi = jnp.where(cos_theta * cos_theta_v > 0, 1.0, 0.0)
    cos_sq = jnp.clip(cos_theta_v * cos_theta_v, 0.0, 1.0)
    # (1 - c)/c  ->  1/c - 1 with the EUP estimate; the clip keeps both the
    # nan_to_num(+inf)->f32max semantics and the >=0 clamp of the reference.
    tan_sq = jnp.clip(recip(cos_sq) - 1.0, 0.0, _F32_MAX)
    denom = 1.0 + jnp.sqrt(1.0 + alpha_sq * tan_sq)            # >= 2
    return chi * (2.0 * recip(denom))


def _microfacet_kernel(in_ref, out_ref, *, L, f0, lvis):
    """in_ref: (3L+7, T) stacked inputs; out_ref: (9L+1, T) stacked outputs."""
    recip = functools.partial(pl.reciprocal, approx=True)      # EUP slot

    pts2c = _normalize3(in_ref[3 * L:3 * L + 3, :])            # (3,T)
    normal = _normalize3(in_ref[3 * L + 3:3 * L + 6, :])       # (3,T)
    rough = in_ref[3 * L + 6:3 * L + 7, :]                     # (1,T)
    alpha = rough * rough
    alpha_sq = alpha * alpha

    # n.v shared by the view-direction G term and v_dot_n.
    v_dot_n_raw = jnp.sum(normal * pts2c, axis=0, keepdims=True)
    v_dot_n = jnp.maximum(jnp.abs(v_dot_n_raw), _MIN_ANGLE)
    out_ref[6 * L:6 * L + 1, :] = v_dot_n

    for l in range(L):  # static unroll; L is tiny (usually 1)
        pts2l = _normalize3(in_ref[3 * l:3 * l + 3, :])        # (3,T)
        h = _normalize3(pts2l + pts2c)                         # (3,T)
        out_ref[6 * L + 1 + 3 * l:6 * L + 4 + 3 * l, :] = h

        # Fresnel (Schlick); l.h reused below for the lvis G term.
        cos_lh = jnp.sum(pts2l * h, axis=0, keepdims=True)     # (1,T)
        out_ref[L + l:L + l + 1, :] = (
            f0 + (1.0 - f0) * (1.0 - cos_lh) ** 5)

        # GGX distribution D (and n_h output).
        n_h = jnp.sum(h * normal, axis=0, keepdims=True)       # (1,T)
        out_ref[5 * L + l:5 * L + l + 1, :] = n_h
        chi_d = jnp.where(n_h > 0, 1.0, 0.0)
        cos_sq = n_h * n_h
        # Exact divide kept: tan^2 is compared against alpha^2 (as small as
        # ~1e-5), so the ~2^-12 error of the EUP estimate would visibly
        # perturb D near h ~ n.  min() reproduces nan_to_num(+inf)->f32max.
        tan_sq = jnp.minimum((1.0 - cos_sq) / cos_sq, _F32_MAX)
        denom_d = np.pi * cos_sq * cos_sq * (alpha_sq + tan_sq) ** 2
        # denom_d can be 0 / inf / NaN at grazing angles -> keep nan_to_num.
        d = jnp.nan_to_num(alpha_sq * chi_d * recip(denom_d))
        out_ref[3 * L + l:3 * L + l + 1, :] = d

        # GGX geometric term G (view direction, optionally * light direction).
        cos_hv = jnp.sum(h * pts2c, axis=0, keepdims=True)     # (1,T)
        g = _g_term(cos_hv, v_dot_n_raw, alpha_sq, recip)
        l_dot_n_raw = jnp.sum(pts2l * normal, axis=0, keepdims=True)
        if lvis:
            # TODO(synk): mirrors torch `pts2l.squeeze()`; well-defined only
            # for a single light (L == 1).  n.l and l.h are shared from above.
            g = g * _g_term(cos_lh, l_dot_n_raw, alpha_sq, recip)
        out_ref[2 * L + l:2 * L + l + 1, :] = g

        l_dot_n = jnp.maximum(jnp.abs(l_dot_n_raw), _MIN_ANGLE)
        out_ref[4 * L + l:4 * L + l + 1, :] = l_dot_n

        denom = 4.0 * l_dot_n * v_dot_n                        # >= 4e-6
        # NOTE: the reference multiplies only the hardcoded 0.04 factor here
        # (f and g are returned but NOT folded into the BRDF); mirrored
        # exactly.  min() reproduces nan_to_num's +inf handling.
        out_ref[l:l + 1, :] = jnp.minimum(0.04 * d * recip(denom), _F32_MAX)


def _choose_tile(n, tile_n=None, max_tile=16384, min_tile=512):
    """Lane-tile heuristic: aim for ~8 grid steps (keeps both v7x TensorCores
    busy with balanced work and several steps per core to hide DMA), floor at
    512 lanes (>=85% of HBM roofline per measured tiled-add sweep), cap at
    16K (per-step VMEM ~ 2.6 MB double-buffered, far under every limit)."""
    if tile_n is not None:
        assert tile_n % 128 == 0, "tile_n must be a multiple of 128"
        return tile_n
    t = -(-n // 8)                 # ~8 steps
    t = -(-t // 256) * 256         # round up to a lane-friendly multiple
    return max(min_tile, min(max_tile, t))


def microfacet_pallas(pts2l, pts2c, normal, albedo=None, rough=None, *,
                      default_rough=0.3, lambert_only=False, f0=0.04,
                      lvis=True, tile_n=None):
    """Pallas implementation of Microfacet.forward (torch layouts in/out)."""
    N, L, _ = pts2l.shape
    f32 = jnp.float32
    if albedo is None:
        albedo = jnp.ones((N, 3), f32)
    if rough is None:
        rough = default_rough * jnp.ones((N, 1), f32)
    if lvis:
        assert L == 1, "lvis branch follows torch's pts2l.squeeze(): needs L == 1"

    tn = _choose_tile(N, tile_n)
    n_pad = -(-N // tn) * tn       # pad N up to a tile multiple (no giant-block fallback)

    # ONE fused pass builds the single lane-dense (channel-major) input.
    stacked_in = jnp.concatenate(
        [pts2l.astype(f32).reshape(N, 3 * L), pts2c.astype(f32),
         normal.astype(f32), rough.astype(f32)], axis=1).T     # (3L+7, N)
    if n_pad != N:
        stacked_in = jnp.pad(stacked_in, ((0, 0), (0, n_pad - N)))

    n_in = 3 * L + 7
    n_out = 9 * L + 1
    kernel = functools.partial(_microfacet_kernel, L=L, f0=f0, lvis=lvis)

    sk = pl.pallas_call(
        kernel,
        out_shape=jax.ShapeDtypeStruct((n_out, n_pad), f32),
        grid_spec=pltpu.PrefetchScalarGridSpec(
            num_scalar_prefetch=0,
            grid=(n_pad // tn,),
            in_specs=[pl.BlockSpec((n_in, tn), lambda i: (0, i))],
            out_specs=pl.BlockSpec((n_out, tn), lambda i: (0, i)),
        ),
        compiler_params=pltpu.CompilerParams(
            dimension_semantics=("parallel",)),
    )(stacked_in)

    sk = sk[:, :N]                 # drop padding lanes

    # Back to torch conventions (thin (N,L)/(N,) slabs; one small pass).
    glossy0 = sk[0 * L:1 * L].T                # (N,L)  == brdf_glossy[:, :, 0]
    f = sk[1 * L:2 * L].T
    g = sk[2 * L:3 * L].T
    d = sk[3 * L:4 * L].T
    ldn = sk[4 * L:5 * L].T
    nh = sk[5 * L:6 * L].T
    vdn = sk[6 * L]                            # (N,)
    h = sk[6 * L + 1:9 * L + 1].T.reshape(N, L, 3)

    # brdf kept in the wrapper: folding it into the kernel would still need a
    # (3L,N)->(N,L,3) de-transpose pass outside, so the split is net-neutral.
    brdf_diffuse = jnp.broadcast_to(albedo.astype(f32)[:, None, :], (N, L, 3))
    brdf = brdf_diffuse if lambert_only else brdf_diffuse + glossy0[:, :, None]

    return glossy0, brdf, f, g, d, ldn, vdn, h, nh


# ----------------------------------------------------------------------------
# Pure-JAX reference that literally mirrors the PyTorch module (torch layouts).
# ----------------------------------------------------------------------------
def _reference_forward(pts2l, pts2c, normal, albedo, rough, *,
                       f0=0.04, lvis=True, lambert_only=False):
    def normalize(x, axis):
        nrm = jnp.sqrt(jnp.sum(x * x, axis=axis, keepdims=True))
        return x / jnp.maximum(nrm, 1e-6)

    pts2l = normalize(pts2l, 2)
    pts2c = normalize(pts2c, 1)
    normal = normalize(normal, 1)
    h = normalize(pts2l + pts2c[:, None, :], 2)
    f = f0 + (1 - f0) * (1 - jnp.sum(pts2l * h, axis=2)) ** 5
    alpha = rough ** 2

    def get_d(m, n, alpha):
        ctm = jnp.einsum('ijk,ik->ij', m, n)
        chi = jnp.where(ctm > 0, 1.0, 0.0)
        csq = ctm ** 2
        tsq = jnp.nan_to_num((1 - csq) / csq)
        denom = np.pi * csq ** 2 * (alpha ** 2 + tsq) ** 2
        return jnp.nan_to_num(alpha ** 2 * chi / denom), ctm

    def get_g(v, m, n, alpha):
        ctv = jnp.einsum('ij,ij->i', n, v)
        ct = jnp.einsum('ijk,ik->ij', m, v)
        chi = jnp.where(jnp.nan_to_num(ct / ctv[:, None]) > 0, 1.0, 0.0)
        cvsq = jnp.clip(ctv ** 2, 0.0, 1.0)
        tvsq = jnp.nan_to_num(
            jnp.clip(jnp.nan_to_num((1 - cvsq) / cvsq), 0.0, np.inf))
        denom = 1 + jnp.sqrt(1 + alpha ** 2 * tvsq[:, None])
        return jnp.nan_to_num(chi * 2 / denom)

    d, n_h = get_d(h, normal, alpha)
    g = get_g(pts2c, h, normal, alpha)
    if lvis:
        g = g * get_g(pts2l[:, 0, :], h, normal, alpha)
    ldn = jnp.maximum(jnp.abs(jnp.einsum('ijk,ik->ij', pts2l, normal)), 1e-3)
    vdn = jnp.maximum(jnp.abs(jnp.einsum('ij,ij->i', pts2c, normal)), 1e-3)
    micro = jnp.nan_to_num(0.04 * d / (4 * ldn * vdn[:, None]))
    glossy = jnp.tile(micro[:, :, None], (1, 1, 3))
    diffuse = jnp.broadcast_to(albedo[:, None, :], glossy.shape)
    brdf = diffuse if lambert_only else diffuse + glossy
    return glossy[:, :, 0], brdf, f, g, d, ldn, vdn, h, n_h


def _check_close(got, want, rtol=1e-2, atol=1e-4, max_bad_frac=1e-3):
    got, want = np.asarray(got), np.asarray(want)
    assert got.shape == want.shape, (got.shape, want.shape)
    bad = ~np.isclose(got, want, rtol=rtol, atol=atol)
    # Tolerate a tiny fraction of boundary disagreements (sign/clamp decisions
    # flipped by 1-ulp rsqrt / approx-reciprocal differences); a real
    # layout/math bug mismatches a large fraction of elements.
    frac = float(bad.mean())
    assert frac <= max_bad_frac, f"mismatch fraction {frac} (shape {got.shape})"


def _make_inputs(key, N, L):
    k1, k2, k3, k4, k5 = jax.random.split(key, 5)
    pts2l = jax.random.normal(k1, (N, L, 3), jnp.float32)
    pts2c = jax.random.normal(k2, (N, 3), jnp.float32)
    normal = jax.random.normal(k3, (N, 3), jnp.float32)
    albedo = jax.nn.sigmoid(jax.random.normal(k4, (N, 3), jnp.float32))
    rough = 0.05 + 0.9 * jax.random.uniform(k5, (N, 1), jnp.float32)
    return pts2l, pts2c, normal, albedo, rough


if __name__ == "__main__":
    key = jax.random.PRNGKey(0)
    key_a, key_b = jax.random.split(key)

    # Main case: N multiple of the tile (grid of 4 lane-dense steps).
    args = _make_inputs(key_a, 2048, 1)
    outs = jax.block_until_ready(microfacet_pallas(*args))
    ref = _reference_forward(*args)
    for got, want in zip(outs, ref):
        _check_close(got, want)

    # Ragged case: exercises the N-padding path (no giant-block fallback).
    args2 = _make_inputs(key_b, 300, 1)
    outs2 = jax.block_until_ready(microfacet_pallas(*args2))
    ref2 = _reference_forward(*args2)
    for got, want in zip(outs2, ref2):
        _check_close(got, want)

    print("KERNEL_OK")
</pallas_src>

<mosaic_0001>
module attributes {stable_mosaic.version = 11 : i64} {
  func.func @_microfacet_kernel(%arg0: i32, %arg1: memref<10x512xf32, #tpu.memory_space<vmem>>, %arg2: memref<10x512xf32, #tpu.memory_space<vmem>>) attributes {dimension_semantics = [#tpu.dimension_semantics<parallel>], iteration_bounds = array<i64: 4>, scalar_prefetch = 0 : i64, scratch_operands = 0 : i64, tpu.core_type = #tpu.core_type<tc>, window_params = [{transform_indices = @transform_0, window_bounds = array<i64: 10, 512>}, {transform_indices = @transform_1, window_bounds = array<i64: 10, 512>}]} {
    %c3 = arith.constant 3 : index
    %c0 = arith.constant 0 : index
    %0 = vector.load %arg1[%c3, %c0] : memref<10x512xf32, #tpu.memory_space<vmem>>, vector<3x512xf32>
    %1 = arith.mulf %0, %0 : vector<3x512xf32>
    %cst = arith.constant dense<0.000000e+00> : vector<512xf32>
    %2 = vector.multi_reduction <add>, %1, %cst [0] : vector<3x512xf32> to vector<512xf32>
    %3 = vector.shape_cast %2 : vector<512xf32> to vector<1x512xf32>
    %cst_0 = arith.constant 9.99999996E-13 : f32
    %4 = vector.broadcast %cst_0 : f32 to vector<1x512xf32>
    %5 = arith.maximumf %3, %4 : vector<1x512xf32>
    %6 = math.rsqrt %5 : vector<1x512xf32>
    %7 = vector.broadcast %6 : vector<1x512xf32> to vector<3x512xf32>
    %8 = arith.mulf %0, %7 : vector<3x512xf32>
    %c6 = arith.constant 6 : index
    %c0_1 = arith.constant 0 : index
    %9 = vector.load %arg1[%c6, %c0_1] : memref<10x512xf32, #tpu.memory_space<vmem>>, vector<3x512xf32>
    %10 = arith.mulf %9, %9 : vector<3x512xf32>
    %cst_2 = arith.constant dense<0.000000e+00> : vector<512xf32>
    %11 = vector.multi_reduction <add>, %10, %cst_2 [0] : vector<3x512xf32> to vector<512xf32>
    %12 = vector.shape_cast %11 : vector<512xf32> to vector<1x512xf32>
    %cst_3 = arith.constant 9.99999996E-13 : f32
    %13 = vector.broadcast %cst_3 : f32 to vector<1x512xf32>
    %14 = arith.maximumf %12, %13 : vector<1x512xf32>
    %15 = math.rsqrt %14 : vector<1x512xf32>
    %16 = vector.broadcast %15 : vector<1x512xf32> to vector<3x512xf32>
    %17 = arith.mulf %9, %16 : vector<3x512xf32>
    %c9 = arith.constant 9 : index
    %c0_4 = arith.constant 0 : index
    %18 = vector.load %arg1[%c9, %c0_4] : memref<10x512xf32, #tpu.memory_space<vmem>>, vector<1x512xf32>
    %19 = arith.mulf %18, %18 : vector<1x512xf32>
    %20 = arith.mulf %19, %19 : vector<1x512xf32>
    %21 = arith.mulf %17, %8 : vector<3x512xf32>
    %cst_5 = arith.constant dense<0.000000e+00> : vector<512xf32>
    %22 = vector.multi_reduction <add>, %21, %cst_5 [0] : vector<3x512xf32> to vector<512xf32>
    %23 = vector.shape_cast %22 : vector<512xf32> to vector<1x512xf32>
    %24 = math.absf %23 : vector<1x512xf32>
    %cst_6 = arith.constant 1.000000e-03 : f32
    %25 = vector.broadcast %cst_6 : f32 to vector<1x512xf32>
    %26 = arith.maximumf %24, %25 : vector<1x512xf32>
    %c6_7 = arith.constant 6 : index
    %c0_8 = arith.constant 0 : index
    %27 = vector.load %arg2[%c6_7, %c0_8] : memref<10x512xf32, #tpu.memory_space<vmem>>, vector<1x512xf32>
    tpu.vector_store %arg2[%c6_7, %c0_8], %26 {strides = array<i32>} : memref<10x512xf32, #tpu.memory_space<vmem>>, vector<1x512xf32>,
    %c0_9 = arith.constant 0 : index
    %c0_10 = arith.constant 0 : index
    %28 = vector.load %arg1[%c0_9, %c0_10] : memref<10x512xf32, #tpu.memory_space<vmem>>, vector<3x512xf32>
    %29 = arith.mulf %28, %28 : vector<3x512xf32>
    %cst_11 = arith.constant dense<0.000000e+00> : vector<512xf32>
    %30 = vector.multi_reduction <add>, %29, %cst_11 [0] : vector<3x512xf32> to vector<512xf32>
    %31 = vector.shape_cast %30 : vector<512xf32> to vector<1x512xf32>
    %cst_12 = arith.constant 9.99999996E-13 : f32
    %32 = vector.broadcast %cst_12 : f32 to vector<1x512xf32>
    %33 = arith.maximumf %31, %32 : vector<1x512xf32>
    %34 = math.rsqrt %33 : vector<1x512xf32>
    %35 = vector.broadcast %34 : vector<1x512xf32> to vector<3x512xf32>
    %36 = arith.mulf %28, %35 : vector<3x512xf32>
    %37 = arith.addf %36, %8 : vector<3x512xf32>
    %38 = arith.mulf %37, %37 : vector<3x512xf32>
    %cst_13 = arith.constant dense<0.000000e+00> : vector<512xf32>
    %39 = vector.multi_reduction <add>, %38, %cst_13 [0] : vector<3x512xf32> to vector<512xf32>
    %40 = vector.shape_cast %39 : vector<512xf32> to vector<1x512xf32>
    %cst_14 = arith.constant 9.99999996E-13 : f32
    %41 = vector.broadcast %cst_14 : f32 to vector<1x512xf32>
    %42 = arith.maximumf %40, %41 : vector<1x512xf32>
    %43 = math.rsqrt %42 : vector<1x512xf32>
    %44 = vector.broadcast %43 : vector<1x512xf32> to vector<3x512xf32>
    %45 = arith.mulf %37, %44 : vector<3x512xf32>
    %c7 = arith.constant 7 : index
    %c0_15 = arith.constant 0 : index
    %46 = vector.load %arg2[%c7, %c0_15] : memref<10x512xf32, #tpu.memory_space<vmem>>, vector<3x512xf32>
    tpu.vector_store %arg2[%c7, %c0_15], %45 {strides = array<i32>} : memref<10x512xf32, #tpu.memory_space<vmem>>, vector<3x512xf32>,
    %47 = arith.mulf %36, %45 : vector<3x512xf32>
    %cst_16 = arith.constant dense<0.000000e+00> : vector<512xf32>
    %48 = vector.multi_reduction <add>, %47, %cst_16 [0] : vector<3x512xf32> to vector<512xf32>
    %49 = vector.shape_cast %48 : vector<512xf32> to vector<1x512xf32>
    %cst_17 = arith.constant 1.000000e+00 : f32
    %50 = vector.broadcast %cst_17 : f32 to vector<1x512xf32>
    %51 = arith.subf %50, %49 : vector<1x512xf32>
    %52 = arith.mulf %51, %51 : vector<1x512xf32>
    %53 = arith.mulf %52, %52 : vector<1x512xf32>
    %54 = arith.mulf %51, %53 : vector<1x512xf32>
    %cst_18 = arith.constant 0.959999978 : f32
    %55 = vector.broadcast %cst_18 : f32 to vector<1x512xf32>
    %56 = arith.mulf %55, %54 : vector<1x512xf32>
    %cst_19 = arith.constant 4.000000e-02 : f32
    %57 = vector.broadcast %cst_19 : f32 to vector<1x512xf32>
    %58 = arith.addf %57, %56 : vector<1x512xf32>
    %c1 = arith.constant 1 : index
    %c0_20 = arith.constant 0 : index
    %59 = vector.load %arg2[%c1, %c0_20] : memref<10x512xf32, #tpu.memory_space<vmem>>, vector<1x512xf32>
    tpu.vector_store %arg2[%c1, %c0_20], %58 {strides = array<i32>} : memref<10x512xf32, #tpu.memory_space<vmem>>, vector<1x512xf32>,
    %60 = arith.mulf %45, %17 : vector<3x512xf32>
    %cst_21 = arith.constant dense<0.000000e+00> : vector<512xf32>
    %61 = vector.multi_reduction <add>, %60, %cst_21 [0] : vector<3x512xf32> to vector<512xf32>
    %62 = vector.shape_cast %61 : vector<512xf32> to vector<1x512xf32>
    %c5 = arith.constant 5 : index
    %c0_22 = arith.constant 0 : index
    %63 = vector.load %arg2[%c5, %c0_22] : memref<10x512xf32, #tpu.memory_space<vmem>>, vector<1x512xf32>
    tpu.vector_store %arg2[%c5, %c0_22], %62 {strides = array<i32>} : memref<10x512xf32, #tpu.memory_space<vmem>>, vector<1x512xf32>,
    %cst_23 = arith.constant 0.000000e+00 : f32
    %64 = vector.broadcast %cst_23 : f32 to vector<1x512xf32>
    %65 = arith.cmpf ogt, %62, %64 : vector<1x512xf32>
    %cst_24 = arith.constant 1.000000e+00 : f32
    %cst_25 = arith.constant 0.000000e+00 : f32
    %66 = vector.broadcast %cst_24 : f32 to vector<1x512xf32>
    %67 = vector.broadcast %cst_25 : f32 to vector<1x512xf32>
    %68 = arith.select %65, %66, %67 : vector<1x512xi1>, vector<1x512xf32>
    %69 = arith.mulf %62, %62 : vector<1x512xf32>
    %cst_26 = arith.constant 1.000000e+00 : f32
    %70 = vector.broadcast %cst_26 : f32 to vector<1x512xf32>
    %71 = arith.subf %70, %69 : vector<1x512xf32>
    %72 = arith.divf %71, %69 : vector<1x512xf32>
    %cst_27 = arith.constant 3.40282347E+38 : f32
    %73 = vector.broadcast %cst_27 : f32 to vector<1x512xf32>
    %74 = arith.minimumf %72, %73 : vector<1x512xf32>
    %cst_28 = arith.constant 3.14159274 : f32
    %75 = vector.broadcast %cst_28 : f32 to vector<1x512xf32>
    %76 = arith.mulf %75, %69 : vector<1x512xf32>
    %77 = arith.mulf %76, %69 : vector<1x512xf32>
    %78 = arith.addf %20, %74 : vector<1x512xf32>
    %79 = arith.mulf %78, %78 : vector<1x512xf32>
    %80 = arith.mulf %77, %79 : vector<1x512xf32>
    %81 = arith.mulf %20, %68 : vector<1x512xf32>
    %82 = tpu.reciprocal %80 {approx = true} : vector<1x512xf32> -> vector<1x512xf32>
    %83 = arith.mulf %81, %82 : vector<1x512xf32>
    %84 = arith.cmpf one, %83, %83 : vector<1x512xf32>
    %cst_29 = arith.constant 0.000000e+00 : f32
    %85 = vector.broadcast %cst_29 : f32 to vector<1x512xf32>
    %86 = arith.select %84, %85, %83 : vector<1x512xi1>, vector<1x512xf32>
    %cst_30 = arith.constant 0x7F800000 : f32
    %87 = vector.broadcast %cst_30 : f32 to vector<1x512xf32>
    %88 = arith.cmpf oeq, %86, %87 : vector<1x512xf32>
    %cst_31 = arith.constant 3.40282347E+38 : f32
    %89 = vector.broadcast %cst_31 : f32 to vector<1x512xf32>
    %90 = arith.select %88, %89, %86 : vector<1x512xi1>, vector<1x512xf32>
    %cst_32 = arith.constant 0xFF800000 : f32
    %91 = vector.broadcast %cst_32 : f32 to vector<1x512xf32>
    %92 = arith.cmpf oeq, %90, %91 : vector<1x512xf32>
    %cst_33 = arith.constant -3.40282347E+38 : f32
    %93 = vector.broadcast %cst_33 : f32 to vector<1x512xf32>
    %94 = arith.select %92, %93, %90 : vector<1x512xi1>, vector<1x512xf32>
    %c3_34 = arith.constant 3 : index
    %c0_35 = arith.constant 0 : index
    %95 = vector.load %arg2[%c3_34, %c0_35] : memref<10x512xf32, #tpu.memory_space<vmem>>, vector<1x512xf32>
    tpu.vector_store %arg2[%c3_34, %c0_35], %94 {strides = array<i32>} : memref<10x512xf32, #tpu.memory_space<vmem>>, vector<1x512xf32>,
    %96 = arith.mulf %45, %8 : vector<3x512xf32>
    %cst_36 = arith.constant dense<0.000000e+00> : vector<512xf32>
    %97 = vector.multi_reduction <add>, %96, %cst_36 [0] : vector<3x512xf32> to vector<512xf32>
    %98 = vector.shape_cast %97 : vector<512xf32> to vector<1x512xf32>
    %99 = arith.mulf %98, %23 : vector<1x512xf32>
    %cst_37 = arith.constant 0.000000e+00 : f32
    %100 = vector.broadcast %cst_37 : f32 to vector<1x512xf32>
    %101 = arith.cmpf ogt, %99, %100 : vector<1x512xf32>
    %cst_38 = arith.constant 1.000000e+00 : f32
    %cst_39 = arith.constant 0.000000e+00 : f32
    %102 = vector.broadcast %cst_38 : f32 to vector<1x512xf32>
    %103 = vector.broadcast %cst_39 : f32 to vector<1x512xf32>
    %104 = arith.select %101, %102, %103 : vector<1x512xi1>, vector<1x512xf32>
    %105 = arith.mulf %23, %23 : vector<1x512xf32>
    %cst_40 = arith.constant 0.000000e+00 : f32
    %cst_41 = arith.constant 1.000000e+00 : f32
    %106 = vector.broadcast %cst_40 : f32 to vector<1x512xf32>
    %107 = arith.maximumf %106, %105 : vector<1x512xf32>
    %108 = vector.broadcast %cst_41 : f32 to vector<1x512xf32>
    %109 = arith.minimumf %108, %107 : vector<1x512xf32>
    %110 = tpu.reciprocal %109 {approx = true} : vector<1x512xf32> -> vector<1x512xf32>
    %cst_42 = arith.constant 1.000000e+00 : f32
    %111 = vector.broadcast %cst_42 : f32 to vector<1x512xf32>
    %112 = arith.subf %110, %111 : vector<1x512xf32>
    %cst_43 = arith.constant 0.000000e+00 : f32
    %cst_44 = arith.constant 3.40282347E+38 : f32
    %113 = vector.broadcast %cst_43 : f32 to vector<1x512xf32>
    %114 = arith.maximumf %113, %112 : vector<1x512xf32>
    %115 = vector.broadcast %cst_44 : f32 to vector<1x512xf32>
    %116 = arith.minimumf %115, %114 : vector<1x512xf32>
    %117 = arith.mulf %20, %116 : vector<1x512xf32>
    %cst_45 = arith.constant 1.000000e+00 : f32
    %118 = vector.broadcast %cst_45 : f32 to vector<1x512xf32>
    %119 = arith.addf %118, %117 : vector<1x512xf32>
    %120 = math.sqrt %119 : vector<1x512xf32>
    %cst_46 = arith.constant 1.000000e+00 : f32
    %121 = vector.broadcast %cst_46 : f32 to vector<1x512xf32>
    %122 = arith.addf %121, %120 : vector<1x512xf32>
    %123 = tpu.reciprocal %122 {approx = true} : vector<1x512xf32> -> vector<1x512xf32>
    %cst_47 = arith.constant 2.000000e+00 : f32
    %124 = vector.broadcast %cst_47 : f32 to vector<1x512xf32>
    %125 = arith.mulf %124, %123 : vector<1x512xf32>
    %126 = arith.mulf %104, %125 : vector<1x512xf32>
    %127 = arith.mulf %36, %17 : vector<3x512xf32>
    %cst_48 = arith.constant dense<0.000000e+00> : vector<512xf32>
    %128 = vector.multi_reduction <add>, %127, %cst_48 [0] : vector<3x512xf32> to vector<512xf32>
    %129 = vector.shape_cast %128 : vector<512xf32> to vector<1x512xf32>
    %130 = arith.mulf %49, %129 : vector<1x512xf32>
    %cst_49 = arith.constant 0.000000e+00 : f32
    %131 = vector.broadcast %cst_49 : f32 to vector<1x512xf32>
    %132 = arith.cmpf ogt, %130, %131 : vector<1x512xf32>
    %cst_50 = arith.constant 1.000000e+00 : f32
    %cst_51 = arith.constant 0.000000e+00 : f32
    %133 = vector.broadcast %cst_50 : f32 to vector<1x512xf32>
    %134 = vector.broadcast %cst_51 : f32 to vector<1x512xf32>
    %135 = arith.select %132, %133, %134 : vector<1x512xi1>, vector<1x512xf32>
    %136 = arith.mulf %129, %129 : vector<1x512xf32>
    %cst_52 = arith.constant 0.000000e+00 : f32
    %cst_53 = arith.constant 1.000000e+00 : f32
    %137 = vector.broadcast %cst_52 : f32 to vector<1x512xf32>
    %138 = arith.maximumf %137, %136 : vector<1x512xf32>
    %139 = vector.broadcast %cst_53 : f32 to vector<1x512xf32>
    %140 = arith.minimumf %139, %138 : vector<1x512xf32>
    %141 = tpu.reciprocal %140 {approx = true} : vector<1x512xf32> -> vector<1x512xf32>
    %cst_54 = arith.constant 1.000000e+00 : f32
    %142 = vector.broadcast %cst_54 : f32 to vector<1x512xf32>
    %143 = arith.subf %141, %142 : vector<1x512xf32>
    %cst_55 = arith.constant 0.000000e+00 : f32
    %cst_56 = arith.constant 3.40282347E+38 : f32
    %144 = vector.broadcast %cst_55 : f32 to vector<1x512xf32>
    %145 = arith.maximumf %144, %143 : vector<1x512xf32>
    %146 = vector.broadcast %cst_56 : f32 to vector<1x512xf32>
    %147 = arith.minimumf %146, %145 : vector<1x512xf32>
    %148 = arith.mulf %20, %147 : vector<1x512xf32>
    %cst_57 = arith.constant 1.000000e+00 : f32
    %149 = vector.broadcast %cst_57 : f32 to vector<1x512xf32>
    %150 = arith.addf %149, %148 : vector<1x512xf32>
    %151 = math.sqrt %150 : vector<1x512xf32>
    %cst_58 = arith.constant 1.000000e+00 : f32
    %152 = vector.broadcast %cst_58 : f32 to vector<1x512xf32>
    %153 = arith.addf %152, %151 : vector<1x512xf32>
    %154 = tpu.reciprocal %153 {approx = true} : vector<1x512xf32> -> vector<1x512xf32>
    %cst_59 = arith.constant 2.000000e+00 : f32
    %155 = vector.broadcast %cst_59 : f32 to vector<1x512xf32>
    %156 = arith.mulf %155, %154 : vector<1x512xf32>
    %157 = arith.mulf %135, %156 : vector<1x512xf32>
    %158 = arith.mulf %126, %157 : vector<1x512xf32>
    %c2 = arith.constant 2 : index
    %c0_60 = arith.constant 0 : index
    %159 = vector.load %arg2[%c2, %c0_60] : memref<10x512xf32, #tpu.memory_space<vmem>>, vector<1x512xf32>
    tpu.vector_store %arg2[%c2, %c0_60], %158 {strides = array<i32>} : memref<10x512xf32, #tpu.memory_space<vmem>>, vector<1x512xf32>,
    %160 = math.absf %129 : vector<1x512xf32>
    %cst_61 = arith.constant 1.000000e-03 : f32
    %161 = vector.broadcast %cst_61 : f32 to vector<1x512xf32>
    %162 = arith.maximumf %160, %161 : vector<1x512xf32>
    %c4 = arith.constant 4 : index
    %c0_62 = arith.constant 0 : index
    %163 = vector.load %arg2[%c4, %c0_62] : memref<10x512xf32, #tpu.memory_space<vmem>>, vector<1x512xf32>
    tpu.vector_store %arg2[%c4, %c0_62], %162 {strides = array<i32>} : memref<10x512xf32, #tpu.memory_space<vmem>>, vector<1x512xf32>,
    %cst_63 = arith.constant 4.000000e+00 : f32
    %164 = vector.broadcast %cst_63 : f32 to vector<1x512xf32>
    %165 = arith.mulf %164, %162 : vector<1x512xf32>
    %166 = arith.mulf %165, %26 : vector<1x512xf32>
    %cst_64 = arith.constant 4.000000e-02 : f32
    %167 = vector.broadcast %cst_64 : f32 to vector<1x512xf32>
    %168 = arith.mulf %167, %94 : vector<1x512xf32>
    %169 = tpu.reciprocal %166 {approx = true} : vector<1x512xf32> -> vector<1x512xf32>
    %170 = arith.mulf %168, %169 : vector<1x512xf32>
    %cst_65 = arith.constant 3.40282347E+38 : f32
    %171 = vector.broadcast %cst_65 : f32 to vector<1x512xf32>
    %172 = arith.minimumf %170, %171 : vector<1x512xf32>
    %c0_66 = arith.constant 0 : index
    %c0_67 = arith.constant 0 : index
    %173 = vector.load %arg2[%c0_66, %c0_67] : memref<10x512xf32, #tpu.memory_space<vmem>>, vector<1x512xf32>
    tpu.vector_store %arg2[%c0_66, %c0_67], %172 {strides = array<i32>} : memref<10x512xf32, #tpu.memory_space<vmem>>, vector<1x512xf32>,
    return
  }
  func.func @transform_0(%arg0: i32) -> (i32, i32) {
    %c0_i32 = arith.constant 0 : i32
    %c0_i32_0 = arith.constant 0 : i32
    return %c0_i32, %arg0 : i32, i32
  }
  func.func @transform_1(%arg0: i32) -> (i32, i32) {
    %c0_i32 = arith.constant 0 : i32
    %c0_i32_0 = arith.constant 0 : i32
    return %c0_i32, %arg0 : i32, i32
  }
}

</mosaic_0001>

<bundles_post_ra>
// kernel: tpu_custom_call.1
= control target key start
LH: loop header
LB: loop body
LE: loop exit
PB: predicated region body
PF: predicated region fallthrough
CT: control target
= control target key end

     0   :  { %6 = vsyncpa [#allocation3], 0  ;;  %s2408_s0 = inlined_call_operand.hbm [shape: f32[10,2048], index: 0, kind: input, shape index: {}]   ;;  %s2409_s1 = inlined_call_operand.hbm [shape: f32[10,2048], index: 1, kind: output, shape index: {}]  }
   0x1   :  { %8 = vsyncpa [#allocation3 + $0x1], 0 }
   0x2   :  { %9 = vsyncpa [#allocation4], 0 }
   0x3   :  { %11 = vsyncpa [#allocation4 + $0x1], 0  ;;  %s1636_s6 = smov 0   ;;  %s1638_s7 = smov 0  }
   0x4   :  { %s1640_s8 = smov 0   ;;  %s1642_s9 = smov 0  }
   0x5 LB: > { %s1657_s10 = sadd.s32 4294967295, %s1614_s9   ;;  %s1353_s11 = sadd.s32 4294967294, %s1614_s9   ;;  %s1614_s9 = sphi %s1642_s9, %s2429_s9   ;;  %s1610_s8 = sphi %s1640_s8, %s2428_s8   ;;  %s1606_s7 = sphi %s1638_s7, %s2427_s7   ;;  %s1602_s6 = sphi %s1636_s6, %s2426_s6  }
   0x6   : > { %s1661_s12 = sadd.s32 1, %s1614_s9   ;;  %s24_s13 = sadd.s32 1, %s1610_s8 }
   0x7   : > { %s21_s14 = ssub.s32 %s1614_s9, %s1661_s12  ;;  %p31_p0 = scmp.ne.s32.totalorder %s1610_s8, %s1606_s7 }
   0x8   : > { %p22_p1 = scmp.eq.s32.totalorder %s21_s14, 0  ;;  %p32_p2 = scmp.eq.s32.totalorder %s1614_s9, 0 }
   0x9   : > { %p37_p3 = scmp.ne.s32.totalorder %s1606_s7, %s1602_s6  ;;  %p38_p4 = scmp.eq.s32.totalorder %s1657_s10, 0 }
   0xa   : > { %s1673_s15 = scalar_select %p22_p1, %s1610_s8, %s24_s13  }
   0xb   : > { %p1675_p5 = por %p32_p2, %p31_p0  ;;  %p1679_p6 = por %p38_p4, %p37_p3 }
   0xc   : > { %p61_p7 = scmp.eq.s32.totalorder %s1657_s10, 3  ;;  %p67_p8 = scmp.eq.s32.totalorder %s1353_s11, 3 }
   0xd   : > { %p1396_p9 = scmp.lt.s32.totalorder %s1614_s9, 4  ;;  %s87_s20 = sand.u32 1, %s1610_s8  }
   0xe   : > { %p1685_p10 = por %p61_p7, %p31_p0  ;;  %p1689_p11 = por %p67_p8, %p37_p3 }
   0xf   : > { %s1382_s21 = sshll.u32 %s1614_s9, 9  ;;  %s1356_s22 = sshll.u32 %s87_s20, 6 }
  0x10   : > { %s2414_s18 = scalar_select %p1685_p10, 1, 0 }
  0x11   : > { %s2415_s19 = scalar_select %p1689_p11, 1, 0 }
  0x12   : > { %s1698_s25 = scalar_lea.hbm %s2408_s0, %s1382_s21  ;;  %s91_s26 = scalar_lea.vmem [#allocation2], %s1356_s22 }
  0x13   : > { %s98_s27 = sshll.u32 %s91_s26, 4  ;;  %p1702_p12 = pnand %p1396_p9, %p1675_p5  ;;  %s1706_s27 = int_to_ptr.vmem [resolvable:$true] %s98_s27 }
  0x14   : > { %s1709_s29 = scalar_lea.sflag [#allocation3], %s87_s20  ;;  %s1518_s30 = scalar_lea.hbm %s1698_s25, 1024 }
  0x15   : > { %p1519_p0 = scmp.ne.s32.totalorder %s1698_s25, %s1518_s30  ;;  %p1520_p1 = pneg %p1702_p12 }
  0x16   : > { %s1523_s4 = scalar_lea.hbm %s2408_s0, 4096  ;;  %p1524_p4 = scmp.lt.u32.totalorder %s1698_s25, %s2408_s0 }
  0x17   : > { %p1521_p2 = pnand %p1520_p1, %p1519_p0  ;;  %p1525_p5 = scmp.lt.u32.totalorder %s1523_s4, %s1518_s30 }
  0x18   : > { %p1527_p8 = scmp.lt.u32.totalorder %s1518_s30, %s1698_s25 }
  0x19   : > { %p1522_p3 = pneg %p1521_p2  ;;  %p1526_p7 = por %p1525_p5, %p1524_p4 }
  0x1b   : > { %p1528_p9 = por %p1527_p8, %p1526_p7 }
  0x1d   : > { %p1529_p13 = pnand %p1528_p9, %p1522_p3 }
  0x1f   : > { %1532 = shalt.err (!%p1529_p13)
}
  0x20   : > { %s1533_s13 = scalar_lea.vmem %s1706_s27, 1024  ;;  %s1616_s14 = smov [#allocation2]  }
  0x21   : > { %p1534_p0 = scmp.ne.s32.totalorder %s1706_s27, %s1533_s13  ;;  %s1538_s16 = sshll.u32 %s1616_s14, 4  ;;  %s1539_s16 = int_to_ptr.vmem [resolvable:$false] %s1538_s16 }
  0x22   : > { %s1540_s20 = scalar_lea.vmem %s1539_s16, 2048  ;;  %p1541_p10 = scmp.lt.s32.totalorder %s1706_s27, %s1539_s16 }
  0x23   : > { %p1536_p2 = pnand %p1534_p0, %p1520_p1  ;;  %p1542_p4 = scmp.lt.s32.totalorder %s1540_s20, %s1533_s13 }
  0x25   : > { %p1537_p11 = pneg %p1536_p2  ;;  %p1543_p5 = por %p1542_p4, %p1541_p10 }
  0x27   : > { %p1544_p7 = pnand %p1543_p5, %p1537_p11 }
  0x29   : > { %1547 = shalt.err (!%p1544_p7)
}
  0x2a   : > { %s1617_s21 = smov 2048   ;;  %s1618_s22 = smov 512  }
  0x2b   : > { %s1619_s23 = smov 32   ;;  %p106_p13 = scmp.lt.s32.totalorder %s1614_s9, 5 }
  0x2c   : > { %1391 = dma.hbm_to_vmem [thread:$0]  (!%p1702_p12), %s1698_s25, 1024, %s1706_s27, %s1709_s29, %s1617_s21, %s1618_s22, %s1619_s23  }
  0x2d   : > { %p2417_p1 = scmp.ge.s32.totalorder %s1614_s9, 1 }
  0x2f   : > { %p107_p3 = pnand %p2417_p1, %p106_p13 }
  0x31   : > { %110 = sbr.rel (%p107_p3) target bundleno = 283 (0x11b), region = 24 }
  0x38   : > { %s1741_s24 = sand.u32 1, %s1606_s7  }
  0x39   : > { %s1360_s26 = sshll.u32 %s1741_s24, 6  ;;  %s113_s30 = scalar_lea.sflag [#allocation3], %s1741_s24 }
  0x3a   : > { %s1747_s2 = scalar_lea.vmem [#allocation2], %s1360_s26 }
  0x3b   : > { %1593 = dma.done.wait (%p1679_p6), %s113_s30, 1024  }
  0x3c   : > { %1595 = vsyncadd (%p1679_p6), %s113_s30, 4294966272  ;;  %vm157_vm0 = vcmask 1042432   ;;  %vm222_vm1 = vcmask 1041408   ;;  %v1754_v0 = vld [vmem:[%s1747_s2] sm:$0x38]  ;;  %s2012_s17 = scalar_lea.vmem [#allocation5], %s1360_s26 }
  0x3d   : > { %v1757_v1 = vld [vmem:[%s1747_s2 + $0x8] sm:$0x38]  ;;  %v1760_v2 = vld [vmem:[%s1747_s2 + $0x10] sm:$0x38]  ;;  %v1763_v3 = vld [vmem:[%s1747_s2 + $0x18] sm:$0x38]  ;;  %v141_v4 = vmul.f32 %v1754_v0, %v1754_v0 }
  0x3e   : > { %v142_v5 = vmul.f32 %v1757_v1, %v1757_v1  ;;  %v143_v6 = vmul.f32 %v1760_v2, %v1760_v2  ;;  %v1772_v7 = vld [vmem:[%s1747_s2] sm:$0xc0]  ;;  %v1775_v8 = vld [vmem:[%s1747_s2 + $0x8] sm:$0xc0]  ;;  %v144_v9 = vmul.f32 %v1763_v3, %v1763_v3  ;;  %v1780_v10 = vld [vmem:[%s1747_s2 + $0x10] sm:$0xc0] }
  0x3f   : > { %v1783_v11 = vld [vmem:[%s1747_s2 + $0x18] sm:$0xc0]  ;;  %v1786_v12 = vld [vmem:[%s1747_s2 + $0x20] sm:$0x1]  ;;  %v206_v13 = vmul.f32 %v1772_v7, %v1772_v7  ;;  %v207_v14 = vmul.f32 %v1775_v8, %v1775_v8  ;;  %v149_v15 = vrot.slane %v141_v4, 3  ;;  %v208_v19 = vmul.f32 %v1780_v10, %v1780_v10  ;;  %s1383_s25 = sshll.u32 %s1657_s10, 9 }
  0x40   : > { %v150_v16 = vrot.slane %v142_v5, 3  ;;  %v151_v17 = vrot.slane %v143_v6, 3  ;;  %v1793_v18 = vld [vmem:[%s1747_s2 + $0x28] sm:$0x1]  ;;  %v152_v20 = vrot.slane %v144_v9, 3  ;;  %v209_v23 = vmul.f32 %v1783_v11, %v1783_v11  ;;  %s1280_s27 = sshll.u32 %s2012_s17, 4  ;;  %s2360_s3 = scalar_lea.hbm %s2409_s1, %s1383_s25  ;;  %s2362_s27 = int_to_ptr.vmem [resolvable:$true] %s1280_s27 }
  0x41   : > { %v1798_v21 = vld [vmem:[%s1747_s2 + $0x30] sm:$0x1]  ;;  %v1801_v22 = vld [vmem:[%s1747_s2 + $0x38] sm:$0x1]  ;;  %v210_v24 = vmul.f32 %v1786_v12, %v1786_v12  ;;  %v211_v25 = vmul.f32 %v1793_v18, %v1793_v18  ;;  %v158_v26 = vsel %vm157_vm0, %v149_v15, 0.0  ;;  %v223_v36 = vrot.slane %v206_v13, 6 }
  0x42   : > { %v165_v27 = vsel %vm157_vm0, %v150_v16, 0.0  ;;  %v172_v28 = vsel %vm157_vm0, %v151_v17, 0.0  ;;  %v212_v29 = vmul.f32 %v1798_v21, %v1798_v21  ;;  %v159_v30 = vrot.slane %v158_v26, 4  ;;  %v1826_v15 = vld [vmem:[%s1747_s2] sm:$0x7]  ;;  %s1267_s10 = scalar_lea.sflag [#allocation4], %s1741_s24 }
  0x43   : > { %v166_v31 = vrot.slane %v165_v27, 4  ;;  %v173_v32 = vrot.slane %v172_v28, 4  ;;  %v179_v33 = vsel %vm157_vm0, %v152_v20, 0.0  ;;  %v213_v35 = vmul.f32 %v1801_v22, %v1801_v22  ;;  %s1548_s4 = scalar_lea.vmem %s2362_s27, 1024  ;;  %p2424_p10 = scmp.ne.s32.totalorder %s2414_s18, 0 }
  0x44   : > { %v180_v34 = vrot.slane %v179_v33, 4  ;;  %v224_v37 = vrot.slane %v210_v24, 6  ;;  %v160_v38 = vadd.f32 %v159_v30, %v158_v26  ;;  %v226_v41 = vrot.slane %v207_v14, 6  ;;  %p1549_p6 = scmp.ne.s32.totalorder %s2362_s27, %s1548_s4  ;;  %s1622_s5 = smov [#allocation5]  }
  0x45   : > { %v167_v39 = vadd.f32 %v166_v31, %v165_v27  ;;  %v174_v40 = vadd.f32 %v173_v32, %v172_v28  ;;  %v227_v44 = vrot.slane %v211_v25, 6  ;;  %v229_v45 = vrot.slane %v208_v19, 6  ;;  %v1829_v27 = vld [vmem:[%s1747_s2 + $0x8] sm:$0x7]  ;;  %s1552_s11 = sshll.u32 %s1622_s5, 4  ;;  %s1553_s11 = int_to_ptr.vmem [resolvable:$false] %s1552_s11 }
  0x46   : > { %v181_v42 = vadd.f32 %v180_v34, %v179_v33  ;;  %v225_v43 = vsel %vm222_vm1, %v223_v36, %v224_v37  ;;  %v161_v46 = vrot.slane %v160_v38, 2  ;;  %v230_v49 = vrot.slane %v212_v29, 6  ;;  %p1550_p11 = pnand %p1549_p6, %p2424_p10  ;;  %s1554_s13 = scalar_lea.vmem %s1553_s11, 2048 }
  0x47   : > { %v168_v47 = vrot.slane %v167_v39, 2  ;;  %v175_v48 = vrot.slane %v174_v40, 2  ;;  %v228_v51 = vsel %vm222_vm1, %v226_v41, %v227_v44  ;;  %v232_v52 = vrot.slane %v209_v23, 6  ;;  %p1555_p8 = scmp.lt.s32.totalorder %s2362_s27, %s1553_s11  ;;  %p1556_p9 = scmp.lt.s32.totalorder %s1554_s13, %s1548_s4 }
  0x48   : > { %v182_v50 = vrot.slane %v181_v42, 2  ;;  %v233_v53 = vrot.slane %v213_v35, 6  ;;  %v162_v54 = vadd.f32 %v161_v46, %v160_v38  ;;  %v231_v57 = vsel %vm222_vm1, %v229_v45, %v230_v49  ;;  %p1551_p12 = pneg %p1550_p11 }
  0x49   : > { %v169_v55 = vadd.f32 %v168_v47, %v167_v39  ;;  %v176_v56 = vadd.f32 %v175_v48, %v174_v40  ;;  %v239_v60 = vsel %vm157_vm0, %v225_v43, 0.0  ;;  %v246_v61 = vsel %vm157_vm0, %v228_v51, 0.0  ;;  %p1557_p0 = por %p1556_p9, %p1555_p8 }
  0x4a   : > { %v183_v58 = vadd.f32 %v182_v50, %v181_v42  ;;  %v234_v59 = vsel %vm222_vm1, %v232_v52, %v233_v53  ;;  %v163_v62 = vrot.slane %v162_v54, 1  ;;  %v240_v5 = vrot.slane %v239_v60, 4  ;;  %v1837_v42 = vld [vmem:[%s1747_s2 + $0x10] sm:$0x7] }
  0x4b   : > { %v170_v63 = vrot.slane %v169_v55, 1  ;;  %v177_v4 = vrot.slane %v176_v56, 1  ;;  %v247_v9 = vrot.slane %v246_v61, 4  ;;  %v253_v13 = vsel %vm157_vm0, %v231_v57, 0.0  ;;  %p1558_p2 = pnand %p1557_p0, %p1551_p12 }
  0x4c   : > { %v184_v6 = vrot.slane %v183_v58, 1  ;;  %v260_v14 = vsel %vm157_vm0, %v234_v59, 0.0  ;;  %v164_v16 = vadd.f32 %v163_v62, %v162_v54  ;;  %v241_v20 = vadd.f32 %v240_v5, %v239_v60 }
  0x4d   : > { %v171_v17 = vadd.f32 %v170_v63, %v169_v55  ;;  %v178_v19 = vadd.f32 %v177_v4, %v176_v56  ;;  %v248_v24 = vadd.f32 %v247_v9, %v246_v61  ;;  %v254_v25 = vrot.slane %v253_v13, 4 }
  0x4e   : > { %v185_v23 = vadd.f32 %v184_v6, %v183_v58  ;;  %v261_v26 = vrot.slane %v260_v14, 4  ;;  %v186_v28 = vmax.f32 %v164_v16, 1e-12  ;;  %v407_v30 = vmul.f32 %v1826_v15, %v1826_v15 }
  0x4f   : > { %v187_v29 = vmax.f32 %v171_v17, 1e-12  ;;  %v188_v31 = vmax.f32 %v178_v19, 1e-12  ;;  %v242_v32 = vrot.slane %v241_v20, 2  ;;  %v249_v33 = vrot.slane %v248_v24, 2 }
  0x50   : > { %v255_v34 = vadd.f32 %v254_v25, %v253_v13  ;;  %v189_v35 = vmax.f32 %v185_v23, 1e-12  ;;  %v262_v36 = vadd.f32 %v261_v26, %v260_v14  ;;  %v411_v37 = vsel %vm157_vm0, %v407_v30, 0.0  ;;  %v1844_v14 = vld [vmem:[%s1747_s2 + $0x18] sm:$0x7] }
  0x51   : > { %v408_v38 = vmul.f32 %v1829_v27, %v1829_v27  ;;  %1438 = vrsqrt.f32 %v186_v28  ;;  %v243_v39 = vadd.f32 %v242_v32, %v241_v20  ;;  %v250_v40 = vadd.f32 %v249_v33, %v248_v24 }
  0x52   : > { %v256_v41 = vrot.slane %v255_v34, 2  ;;  %1440 = vrsqrt.f32 %v187_v29  ;;  %v263_v43 = vrot.slane %v262_v36, 2  ;;  %v412_v44 = vrot.slane %v411_v37, 4 }
  0x53   : > { %v418_v45 = vsel %vm157_vm0, %v408_v38, 0.0  ;;  %1442 = vrsqrt.f32 %v188_v31  ;;  %v244_v46 = vrot.slane %v243_v39, 1  ;;  %v251_v47 = vrot.slane %v250_v40, 1 }
  0x54   : > { %v257_v48 = vadd.f32 %v256_v41, %v255_v34  ;;  %v264_v49 = vadd.f32 %v263_v43, %v262_v36  ;;  %v413_v50 = vadd.f32 %v412_v44, %v411_v37  ;;  %v419_v51 = vrot.slane %v418_v45, 4 }
  0x55   : > { %v409_v52 = vmul.f32 %v1837_v42, %v1837_v42  ;;  %1444 = vrsqrt.f32 %v189_v35  ;;  %v245_v53 = vadd.f32 %v244_v46, %v243_v39  ;;  %v252_v54 = vadd.f32 %v251_v47, %v250_v40 }
  0x56   : > { %v258_v55 = vrot.slane %v257_v48, 1  ;;  %v265_v56 = vrot.slane %v264_v49, 1  ;;  %v414_v57 = vrot.slane %v413_v50, 2  ;;  %v420_v58 = vadd.f32 %v419_v51, %v418_v45 }
  0x57   : > { %v425_v59 = vsel %vm157_vm0, %v409_v52, 0.0  ;;  %v267_v61 = vmax.f32 %v245_v53, 1e-12  ;;  %v268_v62 = vmax.f32 %v252_v54, 1e-12  ;;  %v410_v28 = vmul.f32 %v1844_v14, %v1844_v14 }
  0x58   : > { %v259_v60 = vadd.f32 %v258_v55, %v257_v48  ;;  %v426_v63 = vrot.slane %v425_v59, 4  ;;  %v266_v4 = vadd.f32 %v265_v56, %v264_v49  ;;  %v415_v5 = vadd.f32 %v414_v57, %v413_v50 }
  0x59   : > { %v421_v6 = vrot.slane %v420_v58, 2  ;;  %1446 = vrsqrt.f32 %v267_v61  ;;  %v1855_v38 = vsel %vm157_vm0, %v410_v28, 0.0 }
  0x5a   : > { %v269_v9 = vmax.f32 %v259_v60, 1e-12  ;;  %v427_v13 = vadd.f32 %v426_v63, %v425_v59  ;;  %v270_v16 = vmax.f32 %v266_v4, 1e-12  ;;  %1448 = vrsqrt.f32 %v268_v62 }
  0x5b   : > { %v416_v17 = vrot.slane %v415_v5, 1  ;;  %v422_v19 = vadd.f32 %v421_v6, %v420_v58  ;;  %v1439_v20 = vpop.eup %1438  ;;  %v433_v45 = vrot.slane %v1855_v38, 4 }
  0x5c   : > { %1450 = vrsqrt.f32 %v269_v9  ;;  %v428_v23 = vrot.slane %v427_v13, 2  ;;  %v1441_v24 = vpop.eup %1440  ;;  %v1849_v34 = vmul.f32 %v1439_v20, %v1754_v0 }
  0x5d   : > { %1452 = vrsqrt.f32 %v270_v16  ;;  %v417_v25 = vadd.f32 %v416_v17, %v415_v5  ;;  %v423_v26 = vrot.slane %v422_v19, 1  ;;  %v1443_v29 = vpop.eup %1442  ;;  %v1852_v36 = vmul.f32 %v1441_v24, %v1757_v1 }
  0x5e   : > { %v429_v30 = vadd.f32 %v428_v23, %v427_v13  ;;  %v1860_v40 = vmul.f32 %v1443_v29, %v1760_v2  ;;  %v291_v41 = vrot.slane %v1849_v34, 5  ;;  %v451_v44 = vrot.slane %v1849_v34, 3 }
  0x5f   : > { %v439_v31 = vmax.f32 %v417_v25, 1e-12  ;;  %v424_v32 = vadd.f32 %v423_v26, %v422_v19  ;;  %v1445_v33 = vpop.eup %1444  ;;  %v292_v1 = vrot.slane %v1852_v36, 5  ;;  %v452_v49 = vrot.slane %v1852_v36, 3 }
  0x60   : > { %v430_v35 = vrot.slane %v429_v30, 1  ;;  %v1864_v0 = vmul.f32 %v1445_v33, %v1763_v3  ;;  %v293_v2 = vrot.slane %v1860_v40, 5 }
  0x61   : > { %1454 = vrsqrt.f32 %v439_v31  ;;  %v440_v37 = vmax.f32 %v424_v32, 1e-12 }
  0x62   : > { %v1857_v39 = vadd.f32 %v430_v35, %v429_v30  ;;  %v294_v52 = vrot.slane %v1864_v0, 5 }
  0x63   : > { %1456 = vrsqrt.f32 %v440_v37  ;;  %v1447_v43 = vpop.eup %1446 }
  0x64   : > { %v1449_v46 = vpop.eup %1448  ;;  %v275_v47 = vmul.f32 %v1447_v43, %v1772_v7  ;;  %v279_v48 = vmul.f32 %v1447_v43, %v1786_v12  ;;  %v441_v53 = vmax.f32 %v1857_v39, 1e-12 }
  0x65   : > { %v1874_v51 = vmul.f32 %v1449_v46, %v1775_v8  ;;  %v1877_v3 = vmul.f32 %v1449_v46, %v1793_v18 }
  0x66   : > { %v1451_v50 = vpop.eup %1450  ;;  %v299_v55 = vmul.f32 %v291_v41, %v275_v47  ;;  %v303_v56 = vmul.f32 %v291_v41, %v279_v48  ;;  %v623_v9 = vrot.slane %v275_v47, 6  ;;  %v624_v31 = vrot.slane %v279_v48, 6 }
  0x67   : > { %v1453_v54 = vpop.eup %1452  ;;  %v1882_v7 = vmul.f32 %v1451_v50, %v1780_v10  ;;  %v1885_v12 = vmul.f32 %v1451_v50, %v1798_v21  ;;  %v300_v18 = vmul.f32 %v292_v1, %v1874_v51  ;;  %v304_v58 = vmul.f32 %v292_v1, %v1877_v3 }
  0x68   : > { %v1888_v57 = vmul.f32 %v1453_v54, %v1783_v11  ;;  %v1891_v8 = vmul.f32 %v1453_v54, %v1801_v22  ;;  %v315_v60 = vrot.slane %v299_v55, 6  ;;  %v316_v61 = vrot.slane %v303_v56, 6 }
  0x69   : > { %v301_v59 = vmul.f32 %v293_v2, %v1882_v7  ;;  %v305_v10 = vmul.f32 %v293_v2, %v1885_v12  ;;  %v318_v63 = vrot.slane %v300_v18, 6  ;;  %v319_v11 = vrot.slane %v304_v58, 6 }
  0x6a   : > { %v302_v21 = vmul.f32 %v294_v52, %v1888_v57  ;;  %v306_v62 = vmul.f32 %v294_v52, %v1891_v8  ;;  %v317_v22 = vsel %vm222_vm1, %v315_v60, %v316_v61  ;;  %v376_v54 = vlaneseq }
  0x6b   : > { %v1455_v4 = vpop.eup %1454  ;;  %v321_v5 = vrot.slane %v301_v59, 6  ;;  %v322_v6 = vrot.slane %v305_v10, 6  ;;  %v320_v13 = vsel %vm222_vm1, %v318_v63, %v319_v11  ;;  %v331_v19 = vsel %vm157_vm0, %v317_v22, 0.0 }
  0x6c   : > { %v324_v16 = vrot.slane %v302_v21, 6  ;;  %v325_v17 = vrot.slane %v306_v62, 6  ;;  %v332_v24 = vrot.slane %v331_v19, 4  ;;  %v338_v25 = vsel %vm157_vm0, %v320_v13, 0.0 }
  0x6d   : > { %v1457_v20 = vpop.eup %1456  ;;  %v323_v23 = vsel %vm222_vm1, %v321_v5, %v322_v6  ;;  %v1905_v26 = vmul.f32 %v1455_v4, %v1826_v15  ;;  %v339_v29 = vrot.slane %v338_v25, 4  ;;  %v1916_v15 = vsel %vm222_vm1, %v623_v9, %v624_v31 }
  0x6e   : > { %v326_v28 = vsel %vm222_vm1, %v324_v16, %v325_v17  ;;  %v345_v30 = vsel %vm157_vm0, %v323_v23, 0.0  ;;  %v333_v32 = vadd.f32 %v332_v24, %v331_v19  ;;  %v1919_v1 = vmul.f32 %v1457_v20, %v1829_v27 }
  0x6f   : > { %v346_v33 = vrot.slane %v345_v30, 4  ;;  %v352_v35 = vsel %vm157_vm0, %v326_v28, 0.0  ;;  %v1913_v37 = vadd.f32 %v451_v44, %v1905_v26  ;;  %v340_v41 = vadd.f32 %v339_v29, %v338_v25 }
  0x70   : > { %v353_v43 = vrot.slane %v352_v35, 4  ;;  %v334_v46 = vrot.slane %v333_v32, 2  ;;  %v1006_v2 = vmul.f32 %v1916_v15, %v1905_v26  ;;  %v1928_v55 = vadd.f32 %v452_v49, %v1919_v1 }
  0x71   : > { %v347_v47 = vadd.f32 %v346_v33, %v345_v30  ;;  %v463_v48 = vmul.f32 %v1913_v37, %v1913_v37  ;;  %v341_v50 = vrot.slane %v340_v41, 2  ;;  %v434_v58 = vadd.f32 %v433_v45, %v1855_v38 }
  0x72   : > { %v354_v52 = vadd.f32 %v353_v43, %v352_v35  ;;  %v335_v56 = vadd.f32 %v334_v46, %v333_v32  ;;  %v1010_v61 = vsel %vm157_vm0, %v1006_v2, 0.0  ;;  %v1620_v63 = vmov 1966171168  }
  0x73   : > { %v348_v18 = vrot.slane %v347_v47, 2  ;;  %v467_v27 = vsel %vm157_vm0, %v463_v48, 0.0  ;;  %v342_v59 = vadd.f32 %v341_v50, %v340_v41  ;;  %v374_v11 = vunpack.c.l.s4 %v1620_v63 }
  0x74   : > { %v355_v10 = vrot.slane %v354_v52, 2  ;;  %v468_v60 = vrot.slane %v467_v27, 4  ;;  %v336_v21 = vrot.slane %v335_v56, 1  ;;  %1458 = vrsqrt.f32 %v441_v53 }
  0x75   : > { %v349_v62 = vadd.f32 %v348_v18, %v347_v47  ;;  %v343_v4 = vrot.slane %v342_v59, 1  ;;  %v464_v6 = vmul.f32 %v1928_v55, %v1928_v55  ;;  %v1011_v45 = vrot.slane %v1010_v61, 4 }
  0x76   : > { %v356_v22 = vadd.f32 %v355_v10, %v354_v52  ;;  %v469_v5 = vadd.f32 %v468_v60, %v467_v27  ;;  %v1939_v9 = vadd.f32 %v336_v21, %v335_v56  ;;  %v435_v19 = vrot.slane %v434_v58, 2 }
  0x77   : > { %v350_v38 = vrot.slane %v349_v62, 1  ;;  %v1941_v13 = vadd.f32 %v343_v4, %v342_v59  ;;  %v375_v53 = vunpack.c.0.s8 %v374_v11  ;;  %v1946_v23 = vshrl.u32 %v376_v54, 7 }
  0x78   : > { %v357_v16 = vrot.slane %v356_v22, 1  ;;  %v470_v17 = vrot.slane %v469_v5, 2  ;;  %v359_v39 = vand.u32 2147483647, %v1939_v9  ;;  %v474_v29 = vsel %vm157_vm0, %v464_v6, 0.0 }
  0x79   : > { %v1943_v20 = vadd.f32 %v350_v38, %v349_v62  ;;  %v360_v25 = vand.u32 2147483647, %v1941_v13  ;;  %v1012_v31 = vadd.f32 %v1011_v45, %v1010_v61  ;;  %v626_v32 = vrot.slane %v1874_v51, 6 }
  0x7a   : > { %v1948_v24 = vadd.f32 %v357_v16, %v356_v22  ;;  %v471_v28 = vadd.f32 %v470_v17, %v469_v5  ;;  %v627_v33 = vrot.slane %v1877_v3, 6  ;;  %v1956_v41 = vmax.f32 %v359_v39, 0.001 }
  0x7b   : > { %v361_v30 = vand.u32 2147483647, %v1943_v20  ;;  %v1958_v43 = vmax.f32 %v360_v25, 0.001  ;;  %v436_v46 = vadd.f32 %v435_v19, %v434_v58  ;;  %v1961_v47 = vsub.s32 %v375_v53, %v1946_v23 }
  0x7c   : > { %v362_v35 = vand.u32 2147483647, %v1948_v24  ;;  %vm1963_vm2 = vcmp.lt.s32.totalorder %v376_v54, 512  ;;  %v912_v2 = vmul.f32 %v1939_v9, %v1939_v9  ;;  %v472_v51 = vrot.slane %v471_v28, 1 }
  0x7d   : > { %v475_v50 = vrot.slane %v474_v29, 4  ;;  %v1969_v3 = vmax.f32 %v361_v30, 0.001  ;;  %v371_v56 = vcombine.low %v1956_v41, %v1958_v43  ;;  %v913_v18 = vmul.f32 %v1941_v13, %v1941_v13 }
  0x7e   : > { %v1971_v52 = vmax.f32 %v362_v35, 0.001  ;;  %v1459_v27 = vpop.eup %1458  ;;  %v473_v54 = vadd.f32 %v472_v51, %v471_v28  ;;  %v1013_v58 = vrot.slane %v1012_v31, 2  ;;  %v1978_v59 = vsel %vm222_vm1, %v626_v32, %v627_v33 }
  0x7f   : > { %v453_v10 = vrot.slane %v1860_v40, 3  ;;  %v379_v61 = vrot.slane %v371_v56, %v1961_v47  ;;  %v914_v21 = vmul.f32 %v1943_v20, %v1943_v20  ;;  %v437_v62 = vrot.slane %v436_v46, 1 }
  0x80   : > { %v372_v60 = vcombine.low %v1969_v3, %v1971_v52  ;;  %v915_v63 = vmul.f32 %v1948_v24, %v1948_v24  ;;  %v916_v11 = vmax.f32 %v912_v2, 0.0  ;;  %v495_v4 = vmax.f32 %v473_v54, 1e-12 }
  0x81   : > { %v476_v22 = vadd.f32 %v475_v50, %v474_v29  ;;  %v917_v6 = vmax.f32 %v913_v18, 0.0  ;;  %v1007_v38 = vmul.f32 %v1978_v59, %v1919_v1  ;;  %v1992_v45 = vmul.f32 %v1459_v27, %v1837_v42 }
  0x82   : > { %v386_v5 = vrot.slane %v372_v60, %v1961_v47  ;;  %1460 = vrsqrt.f32 %v495_v4  ;;  %v1014_v16 = vadd.f32 %v1013_v58, %v1012_v31  ;;  %v629_v19 = vrot.slane %v1882_v7, 6 }
  0x83   : > { %v477_v17 = vrot.slane %v476_v22, 2  ;;  %v1017_v53 = vsel %vm157_vm0, %v1007_v38, 0.0  ;;  %v1999_v25 = vadd.f32 %v453_v10, %v1992_v45  ;;  %v630_v28 = vrot.slane %v1885_v12, 6 }
  0x84   : > { %v387_v39 = vcombine.low %v379_v61, %v386_v5  ;;  %v918_v29 = vmax.f32 %v914_v21, 0.0  ;;  %v920_v30 = vmin.f32 %v916_v11, 1.0  ;;  %v438_v32 = vadd.f32 %v437_v62, %v436_v46 }
  0x85   : > { %v478_v42 = vadd.f32 %v477_v17, %v476_v22  ;;  %v1018_v33 = vrot.slane %v1017_v53, 4  ;;  %v465_v7 = vmul.f32 %v1999_v25, %v1999_v25  ;;  %v2006_v35 = vsel %vm222_vm1, %v629_v19, %v630_v28 }
  0x86   : > { %v394_v31 = vrot.slane %v387_v39, %v1961_v47  ;;  %v921_v2 = vmin.f32 %v917_v6, 1.0  ;;  %v1015_v51 = vrot.slane %v1014_v16, 1  ;;  %v1008_v56 = vmul.f32 %v2006_v35, %v1992_v45 }
  0x87   : > { %v479_v50 = vrot.slane %v478_v42, 1  ;;  %v481_v12 = vsel %vm157_vm0, %v465_v7, 0.0  ;;  %v442_v46 = vmax.f32 %v438_v32, 1e-12  ;;  %v919_v18 = vmax.f32 %v915_v63, 0.0 }
  0x88   : > { %1363 = vst.msk [vmem:[%s2012_s17 + $0x6] ss:$8 sm:$0xf] %vm1963_vm2, %v394_v31  ;;  %1462 = vrcp.f32 %v920_v30  ;;  %v482_v54 = vrot.slane %v481_v12, 4  ;;  %v1019_v58 = vadd.f32 %v1018_v33, %v1017_v53  ;;  %v1024_v60 = vsel %vm157_vm0, %v1008_v56, 0.0 }
  0x89   : > { %v480_v27 = vadd.f32 %v479_v50, %v478_v42  ;;  %1464 = vrsqrt.f32 %v442_v46  ;;  %v922_v61 = vmin.f32 %v918_v29, 1.0  ;;  %v2019_v21 = vadd.f32 %v1015_v51, %v1014_v16 }
  0x8a   : > { %1466 = vrcp.f32 %v921_v2  ;;  %v483_v11 = vadd.f32 %v482_v54, %v481_v12  ;;  %v1025_v4 = vrot.slane %v1024_v60, 4  ;;  %v923_v5 = vmin.f32 %v919_v18, 1.0 }
  0x8b   : > { %v496_v62 = vmax.f32 %v480_v27, 1e-12  ;;  %v1020_v6 = vrot.slane %v1019_v58, 2  ;;  %v1050_v17 = vmul.f32 %v2019_v21, %v2019_v21  ;;  %v632_v53 = vrot.slane %v1888_v57, 6 }
  0x8c   : > { %v1461_v22 = vpop.eup %1460  ;;  %v484_v38 = vrot.slane %v483_v11, 2  ;;  %v1026_v19 = vadd.f32 %v1025_v4, %v1024_v60  ;;  %v633_v28 = vrot.slane %v1891_v8, 6  ;;  %v2042_v12 = vsub.s32 0, %v1946_v23 }
  0x8d   : > { %1468 = vrsqrt.f32 %v496_v62  ;;  %v503_v63 = vmul.f32 %v1461_v22, %v1913_v37  ;;  %v1021_v30 = vadd.f32 %v1020_v6, %v1019_v58  ;;  %v1054_v7 = vmax.f32 %v1050_v17, 0.0 }
  0x8e   : > { %1470 = vrcp.f32 %v922_v61  ;;  %v485_v42 = vadd.f32 %v484_v38, %v483_v11  ;;  %v1027_v32 = vrot.slane %v1026_v19, 2  ;;  %v2036_v51 = vsel %vm222_vm1, %v632_v53, %v633_v28 }
  0x8f   : > { %v511_v39 = vrot.slane %v503_v63, 1  ;;  %v527_v16 = vmul.f32 %v503_v63, %v1905_v26  ;;  %1472 = vrcp.f32 %v923_v5  ;;  %v2029_v29 = vmul.f32 %v503_v63, %v451_v44 }
  0x90   : > { %v454_v26 = vrot.slane %v1864_v0, 3  ;;  %v639_v57 = vmul.f32 %v1916_v15, %v503_v63  ;;  %v486_v8 = vrot.slane %v485_v42, 1  ;;  %v1028_v50 = vadd.f32 %v1027_v32, %v1026_v19 }
  0x91   : > { %519 = vst [vmem:[%s2012_s17 + $0x20] ss:$-28 sps:$4 sm:$0x83] %v511_v39   ;;  %v531_v37 = vsel %vm157_vm0, %v527_v16, 0.0  ;;  %v1022_v46 = vrot.slane %v1021_v30, 1  ;;  %v1058_v58 = vmin.f32 %v1054_v7, 1.0 }
  0x92   : > { %v1463_v31 = vpop.eup %1462  ;;  %v532_v33 = vrot.slane %v531_v37, 4  ;;  %v487_v18 = vadd.f32 %v486_v8, %v485_v42  ;;  %v1029_v22 = vrot.slane %v1028_v50, 1 }
  0x93   : > { %v1465_v2 = vpop.eup %1464  ;;  %v1367_v54 = vadd.f32 -1.0, %v1463_v31  ;;  %v2058_v39 = vadd.f32 %v1022_v46, %v1021_v30 }
  0x94   : > { %v1467_v34 = vpop.eup %1466  ;;  %v533_v44 = vadd.f32 %v532_v33, %v531_v37  ;;  %v2039_v56 = vmul.f32 %v1465_v2, %v1844_v14  ;;  %v643_v14 = vsel %vm157_vm0, %v639_v57, 0.0  ;;  %v497_v11 = vmax.f32 %v487_v18, 1e-12 }
  0x95   : > { %v1368_v61 = vadd.f32 -1.0, %v1467_v34  ;;  %v644_v53 = vrot.slane %v643_v14, 4  ;;  %v932_v7 = vmax.f32 %v1367_v54, 0.0  ;;  %v1051_v46 = vmul.f32 %v2058_v39, %v2058_v39 }
  0x96   : > { %v2047_v15 = vadd.f32 %v454_v26, %v2039_v56  ;;  %v1009_v60 = vmul.f32 %v2036_v51, %v2039_v56  ;;  %v534_v6 = vrot.slane %v533_v44, 2  ;;  %1474 = vrsqrt.f32 %v497_v11 }
  0x97   : > { %v1469_v27 = vpop.eup %1468  ;;  %v933_v8 = vmax.f32 %v1368_v61, 0.0  ;;  %v2071_v18 = vsub.s32 1, %v1946_v23  ;;  %1476 = vrcp.f32 %v1058_v58  ;;  %v2075_v54 = vmin.f32 %v932_v7, 3.4028235e+38 }
  0x98   : > { %v504_v62 = vmul.f32 %v1469_v27, %v1928_v55  ;;  %v1471_v4 = vpop.eup %1470  ;;  %v466_v5 = vmul.f32 %v2047_v15, %v2047_v15  ;;  %v1031_v63 = vsel %vm157_vm0, %v1009_v60, 0.0  ;;  %v535_v30 = vadd.f32 %v534_v6, %v533_v44 }
  0x99   : > { %v1473_v16 = vpop.eup %1472  ;;  %v1032_v31 = vrot.slane %v1031_v63, 4  ;;  %v1055_v6 = vmax.f32 %v1051_v46, 0.0 }
  0x9a   : > { %v512_v38 = vrot.slane %v504_v62, 1  ;;  %v528_v17 = vmul.f32 %v504_v62, %v1919_v1  ;;  %v640_v19 = vmul.f32 %v1978_v59, %v504_v62  ;;  %v869_v55 = vmul.f32 %v504_v62, %v452_v49 }
  0x9b   : > { %v488_v28 = vsel %vm157_vm0, %v466_v5, 0.0  ;;  %v1369_v1 = vadd.f32 -1.0, %v1471_v4  ;;  %v2066_v59 = vadd.f32 %v1029_v22, %v1028_v50  ;;  %v1033_v36 = vadd.f32 %v1032_v31, %v1031_v63 }
  0x9c   : > { %520 = vst [vmem:[%s2012_s17 + $0x28] ss:$-28 sps:$4 sm:$0x83] %v512_v38   ;;  %v538_v37 = vsel %vm157_vm0, %v528_v17, 0.0  ;;  %v650_v42 = vsel %vm157_vm0, %v640_v19, 0.0  ;;  %v489_v32 = vrot.slane %v488_v28, 4  ;;  %v645_v62 = vadd.f32 %v644_v53, %v643_v14 }
  0x9d   : > { %v539_v33 = vrot.slane %v538_v37, 4  ;;  %v651_v2 = vrot.slane %v650_v42, 4  ;;  %v1370_v49 = vadd.f32 -1.0, %v1473_v16  ;;  %v1034_v60 = vrot.slane %v1033_v36, 2 }
  0x9e   : > { %v490_v57 = vadd.f32 %v489_v32, %v488_v28  ;;  %v934_v11 = vmax.f32 %v1369_v1, 0.0  ;;  %v1052_v44 = vmul.f32 %v2066_v59, %v2066_v59  ;;  %v536_v50 = vrot.slane %v535_v30, 1 }
  0x9f   : > { %v540_v34 = vadd.f32 %v539_v33, %v538_v37  ;;  %v1035_v61 = vadd.f32 %v1034_v60, %v1033_v36  ;;  %v652_v22 = vadd.f32 %v651_v2, %v650_v42  ;;  %v935_v5 = vmax.f32 %v1370_v49, 0.0 }
  0xa0   : > { %v491_v27 = vrot.slane %v490_v57, 2  ;;  %v2077_v63 = vmin.f32 %v933_v8, 3.4028235e+38  ;;  %v872_v17 = vsel %vm157_vm0, %v2029_v29, 0.0  ;;  %v646_v58 = vrot.slane %v645_v62, 2  ;;  %v1475_v16 = vpop.eup %1474 }
  0xa1   : > { %v541_v38 = vrot.slane %v540_v34, 2  ;;  %v1036_v19 = vrot.slane %v1035_v61, 1  ;;  %v2081_v53 = vmin.f32 %v934_v11, 3.4028235e+38  ;;  %v879_v28 = vsel %vm157_vm0, %v869_v55, 0.0 }
  0xa2   : > { %v492_v4 = vadd.f32 %v491_v27, %v490_v57  ;;  %v1056_v37 = vmax.f32 %v1052_v44, 0.0  ;;  %v2084_v32 = vadd.f32 %v536_v50, %v535_v30  ;;  %v505_v42 = vmul.f32 %v1475_v16, %v1999_v25  ;;  %v2097_v50 = vpop.eup %1476 }
  0xa3   : > { %v2087_v1 = vadd.f32 %v1036_v19, %v1035_v61  ;;  %v653_v33 = vrot.slane %v652_v22, 2  ;;  %v939_v7 = vmin.f32 %v935_v5, 3.4028235e+38  ;;  %v873_v29 = vrot.slane %v872_v17, 4 }
  0xa4   : > { %v493_v14 = vrot.slane %v492_v4, 1  ;;  %v1059_v2 = vmin.f32 %v1055_v6, 1.0  ;;  %v542_v57 = vadd.f32 %v541_v38, %v540_v34  ;;  %v513_v36 = vrot.slane %v505_v42, 1 }
  0xa5   : > { %v529_v49 = vmul.f32 %v505_v42, %v1992_v45  ;;  %v641_v8 = vmul.f32 %v2006_v35, %v505_v42  ;;  %v647_v55 = vadd.f32 %v646_v58, %v645_v62  ;;  %v880_v46 = vrot.slane %v879_v28, 4  ;;  %v1362_v58 = vld [vmem:[%s1747_s2 + $0x21] ss:$8 sm:$0xf] }
  0xa6   : > { %v494_v31 = vadd.f32 %v493_v14, %v492_v4  ;;  %v1053_v25 = vmul.f32 %v2087_v1, %v2087_v1  ;;  %v559_v27 = vsub.f32 1.0, %v2084_v32  ;;  %521 = vst [vmem:[%s2012_s17 + $0x30] ss:$-28 sps:$4 sm:$0x83] %v513_v36   ;;  %v1060_v34 = vmin.f32 %v1056_v37, 1.0 }
  0xa7   : > { %v545_v60 = vsel %vm157_vm0, %v529_v49, 0.0  ;;  %v657_v11 = vsel %vm157_vm0, %v641_v8, 0.0  ;;  %v654_v44 = vadd.f32 %v653_v33, %v652_v22  ;;  %v543_v62 = vrot.slane %v542_v57, 1 }
  0xa8   : > { %v498_v30 = vmax.f32 %v494_v31, 1e-12  ;;  %v546_v45 = vrot.slane %v545_v60, 4  ;;  %v658_v35 = vrot.slane %v657_v11, 4  ;;  %v944_v4 = vcombine.low %v2075_v54, %v2077_v63 }
  0xa9   : > { %v945_v61 = vcombine.low %v2081_v53, %v939_v7  ;;  %v1057_v5 = vmax.f32 %v1053_v25, 0.0  ;;  %v648_v6 = vrot.slane %v647_v55, 1  ;;  %v563_v14 = vmul.f32 %v559_v27, %v559_v27 }
  0xaa   : > { %1478 = vrsqrt.f32 %v498_v30  ;;  %v547_v38 = vadd.f32 %v546_v45, %v545_v60  ;;  %v659_v19 = vadd.f32 %v658_v35, %v657_v11  ;;  %v874_v16 = vadd.f32 %v873_v29, %v872_v17 }
  0xab   : > { %1480 = vrcp.f32 %v1059_v2  ;;  %v881_v22 = vadd.f32 %v880_v46, %v879_v28  ;;  %v1061_v37 = vmin.f32 %v1057_v5, 1.0  ;;  %v2103_v31 = vadd.f32 %v543_v62, %v542_v57 }
  0xac   : > { %1482 = vrcp.f32 %v1060_v34  ;;  %v548_v33 = vrot.slane %v547_v38, 2  ;;  %v655_v36 = vrot.slane %v654_v44, 1  ;;  %v660_v49 = vrot.slane %v659_v19, 2 }
  0xad   : > { %v2106_v54 = vsub.s32 2, %v1946_v23  ;;  %v870_v63 = vmul.f32 %v505_v42, %v453_v10  ;;  %v2110_v53 = vadd.f32 %v648_v6, %v647_v55  ;;  %v285_v7 = vmul.f32 %v1362_v58, %v1362_v58 }
  0xae   : > { %1484 = vrcp.f32 %v1061_v37  ;;  %v549_v2 = vadd.f32 %v548_v33, %v547_v38  ;;  %v567_v17 = vmul.f32 %v563_v14, %v563_v14  ;;  %v661_v28 = vadd.f32 %v660_v49, %v659_v19 }
  0xaf   : > { %v2113_v29 = vsub.s32 3, %v1946_v23  ;;  %v875_v57 = vrot.slane %v874_v16, 2  ;;  %v882_v8 = vrot.slane %v881_v22, 2  ;;  %v952_v46 = vrot.slane %v944_v4, %v1961_v47 }
  0xb0   : > { %v550_v30 = vrot.slane %v549_v2, 1  ;;  %v560_v25 = vsub.f32 1.0, %v2103_v31  ;;  %v2117_v60 = vadd.f32 %v655_v36, %v654_v44  ;;  %v959_v40 = vrot.slane %v945_v61, %v1961_v47 }
  0xb1   : > { %v886_v10 = vsel %vm157_vm0, %v870_v63, 0.0  ;;  %v2121_v42 = vmul.f32 %v285_v7, %v285_v7  ;;  %v571_v23 = vmul.f32 %v567_v17, %v559_v27  ;;  %v662_v34 = vrot.slane %v661_v28, 1 }
  0xb2   : > { %v675_v45 = vcombine.low %v2110_v53, %v2117_v60  ;;  %v2128_v35 = vmul.f32 %v2110_v53, %v2110_v53  ;;  %v2130_v44 = vadd.f32 %v875_v57, %v874_v16  ;;  %v2132_v62 = vadd.f32 %v882_v8, %v881_v22 }
  0xb3   : > { %v2135_v61 = vadd.f32 %v550_v30, %v549_v2  ;;  %v887_v6 = vrot.slane %v886_v10, 4  ;;  %v564_v27 = vmul.f32 %v560_v25, %v560_v25  ;;  %v960_v14 = vcombine.low %v952_v46, %v959_v40 }
  0xb4   : > { %v1479_v11 = vpop.eup %1478  ;;  %v2142_v22 = vmul.f32 %v2117_v60, %v2117_v60  ;;  %v2144_v33 = vadd.f32 %v662_v34, %v661_v28  ;;  %v2147_v36 = vrot.slane %v675_v45, %v1961_v47  ;;  %1486 = vrcp.f32 %v2128_v35 }
  0xb5   : > { %v506_v4 = vmul.f32 %v1479_v11, %v2047_v15  ;;  %2420 = vst [vmem:[#allocation8_spill] sm:$0xff] %v2135_v61  ;;  %v1481_v5 = vpop.eup %1480  ;;  %v575_v15 = vmul.f32 0.96, %v571_v23  ;;  %v888_v2 = vadd.f32 %v887_v6, %v886_v10  ;;  %v967_v28 = vrot.slane %v960_v14, %v1961_v47 }
  0xb6   : > { %v1483_v19 = vpop.eup %1482  ;;  %v568_v8 = vmul.f32 %v564_v27, %v564_v27  ;;  %1488 = vrcp.f32 %v2142_v22  ;;  %v1372_v46 = vadd.f32 -1.0, %v1481_v5  ;;  %v2161_v34 = vmul.f32 %v2144_v33, %v2144_v33 }
  0xb7   : > { %v514_v58 = vrot.slane %v506_v4, 1  ;;  %v530_v37 = vmul.f32 %v506_v4, %v2039_v56  ;;  %v642_v16 = vmul.f32 %v2036_v51, %v506_v4  ;;  %v561_v56 = vsub.f32 1.0, %v2135_v61 }
  0xb8   : > { %v1371_v51 = vadd.f32 -1.0, %v2097_v50  ;;  %v1485_v7 = vpop.eup %1484  ;;  %v1373_v30 = vadd.f32 -1.0, %v1483_v19  ;;  %v871_v11 = vmul.f32 %v506_v4, %v454_v26  ;;  %v2163_v10 = vadd.f32 0.04, %v575_v15 }
  0xb9   : > { %522 = vst [vmem:[%s2012_s17 + $0x38] ss:$-28 sps:$4 sm:$0x83] %v514_v58   ;;  %v552_v49 = vsel %vm157_vm0, %v530_v37, 0.0  ;;  %v664_v63 = vsel %vm157_vm0, %v642_v16, 0.0  ;;  %v565_v50 = vmul.f32 %v561_v56, %v561_v56  ;;  %v1374_v45 = vadd.f32 -1.0, %v1485_v7 }
  0xba   : > { %v553_v17 = vrot.slane %v552_v49, 4  ;;  %v665_v57 = vrot.slane %v664_v63, 4  ;;  %v1070_v6 = vmax.f32 %v1371_v51, 0.0  ;;  %v731_v58 = vmul.f32 3.1415927, %v2128_v35 }
  0xbb   : > { %vm703_vm3 = vcmp.gt.f32.partialorder %v2110_v53, 0.0  ;;  %v969_v5 = vmul.f32 %v967_v28, %v2121_v42  ;;  %v889_v0 = vrot.slane %v888_v2, 2  ;;  %v572_v26 = vmul.f32 %v568_v8, %v560_v25 }
  0xbc   : > { %v554_v40 = vadd.f32 %v553_v17, %v552_v49  ;;  %v666_v23 = vadd.f32 %v665_v57, %v664_v63  ;;  %v1071_v4 = vmax.f32 %v1372_v46, 0.0  ;;  %v1072_v19 = vmax.f32 %v1373_v30, 0.0 }
  0xbd   : > { %v893_v37 = vsel %vm157_vm0, %v871_v11, 0.0  ;;  %1490 = vrcp.f32 %v2161_v34  ;;  %v569_v15 = vmul.f32 %v565_v50, %v565_v50  ;;  %v1073_v63 = vmax.f32 %v1374_v45, 0.0 }
  0xbe   : > { %v555_v14 = vrot.slane %v554_v40, 2  ;;  %v667_v27 = vrot.slane %v666_v23, 2  ;;  %v1074_v51 = vmin.f32 %v1070_v6, 3.4028235e+38  ;;  %v1075_v7 = vmin.f32 %v1071_v4, 3.4028235e+38  ;;  %v1487_v17 = vpop.eup %1486 }
  0xbf   : > { %v2170_v38 = vadd.f32 1.0, %v969_v5  ;;  %v1076_v28 = vmin.f32 %v1072_v19, 3.4028235e+38  ;;  %v576_v61 = vmul.f32 0.96, %v572_v26  ;;  %v716_v25 = vsub.f32 1.0, %v2142_v22 }
  0xc0   : > { %v556_v16 = vadd.f32 %v555_v14, %v554_v40  ;;  %v668_v49 = vadd.f32 %v667_v27, %v666_v23  ;;  %v1077_v8 = vmin.f32 %v1073_v63, 3.4028235e+38  ;;  %v1082_v46 = vcombine.low %v1074_v51, %v1075_v7  ;;  %v1489_v23 = vpop.eup %1488 }
  0xc1   : > { %v732_v11 = vmul.f32 3.1415927, %v2142_v22  ;;  %vm704_vm4 = vcmp.gt.f32.partialorder %v2117_v60, 0.0  ;;  %v894_v50 = vrot.slane %v893_v37, 4  ;;  %v573_v45 = vmul.f32 %v569_v15, %v561_v56 }
  0xc2   : > { %v557_v57 = vrot.slane %v556_v16, 1  ;;  %v669_v55 = vrot.slane %v668_v49, 1  ;;  %v1083_v6 = vcombine.low %v1076_v28, %v1077_v8  ;;  %v1090_v14 = vrot.slane %v1082_v46, %v1961_v47 }
  0xc3   : > { %1492 = vrsqrt.f32 %v2170_v38  ;;  %v580_v4 = vadd.f32 0.04, %v576_v61  ;;  %v2421_v19 = vsub.f32 1.0, %v2128_v35  ;;  %v722_v63 = vmul.f32 %v1489_v23, %v716_v25 }
  0xc4   : > { %v2173_v30 = vadd.f32 %v557_v57, %v556_v16  ;;  %v2175_v40 = vadd.f32 %v669_v55, %v668_v49  ;;  %v2188_v55 = vadd.f32 %v889_v0, %v888_v2  ;;  %v1097_v16 = vrot.slane %v1083_v6, %v1961_v47 }
  0xc5   : > { %v720_v56 = vmul.f32 %v1487_v17, %v2421_v19  ;;  %v895_v51 = vadd.f32 %v894_v50, %v893_v37  ;;  %v577_v7 = vmul.f32 0.96, %v573_v45  ;;  %v1621_v57 = vmov 0.0  }
  0xc6   : > { %v562_v27 = vsub.f32 1.0, %v2173_v30  ;;  %v676_v5 = vcombine.low %v2144_v33, %v2175_v40  ;;  %v2185_v26 = vmul.f32 %v2175_v40, %v2175_v40  ;;  %v2198_v2 = vsel %vm703_vm3, 1.0, %v1621_v57 }
  0xc7   : > { %v1098_v61 = vcombine.low %v1090_v14, %v1097_v16  ;;  %v1491_v0 = vpop.eup %1490  ;;  %v2204_v25 = vsel %vm704_vm4, 1.0, %v1621_v57  ;;  %v2207_v37 = vmul.f32 %v731_v58, %v2128_v35  ;;  %v717_v8 = vsub.f32 1.0, %v2161_v34 }
  0xc8   : > { %v566_v49 = vmul.f32 %v562_v27, %v562_v27  ;;  %v690_v15 = vrot.slane %v676_v5, %v1961_v47  ;;  %1494 = vrcp.f32 %v2185_v26  ;;  %v727_v46 = vmin.f32 %v720_v56, 3.4028235e+38 }
  0xc9   : > { %v2211_v53 = vmul.f32 %v732_v11, %v2142_v22  ;;  %v1105_v23 = vrot.slane %v1098_v61, %v1961_v47  ;;  %v728_v60 = vmin.f32 %v722_v63, 3.4028235e+38  ;;  %v896_v6 = vrot.slane %v895_v51, 2 }
  0xca   : > { %v570_v28 = vmul.f32 %v566_v49, %v566_v49  ;;  %v691_v17 = vcombine.low %v2147_v36, %v690_v15  ;;  %v587_v36 = vcombine.low %v2163_v10, %v580_v4  ;;  %v581_v14 = vadd.f32 0.04, %v577_v7 }
  0xcb   : > { %vm705_vm5 = vcmp.gt.f32.partialorder %v2144_v33, 0.0  ;;  %v1107_v35 = vmul.f32 %v1105_v23, %v2121_v42  ;;  %v799_v22 = vcombine.low %v2198_v2, %v2204_v25  ;;  %v1181_v11 = vand.u32 2147483647, %v2058_v39 }
  0xcc   : > { %v574_v50 = vmul.f32 %v570_v28, %v562_v27  ;;  %v698_v45 = vrot.slane %v691_v17, %v1961_v47  ;;  %v1182_v10 = vand.u32 2147483647, %v2066_v59  ;;  %v718_v27 = vsub.f32 1.0, %v2185_v26 }
  0xcd   : > { %v724_v5 = vmul.f32 %v1491_v0, %v717_v8  ;;  %v2226_v4 = vadd.f32 1.0, %v1107_v35  ;;  %v1183_v19 = vand.u32 2147483647, %v2087_v1  ;;  %v1493_v56 = vpop.eup %1492  ;;  %v595_v49 = vrot.slane %v587_v36, %v1961_v47 }
  0xce   : > { %v578_v58 = vmul.f32 0.96, %v574_v50  ;;  %1365 = vst.msk [vmem:[%s2012_s17 + $0x5] ss:$8 sm:$0xf] %vm1963_vm2, %v698_v45  ;;  %v743_v63 = vcombine.low %v727_v46, %v728_v60  ;;  %vm706_vm6 = vcmp.gt.f32.partialorder %v2175_v40, 0.0  ;;  %v897_v17 = vadd.f32 %v896_v6, %v895_v51 }
  0xcf   : > { %v733_v15 = vmul.f32 3.1415927, %v2161_v34  ;;  %v2235_v7 = vsel %vm705_vm5, 1.0, %v1621_v57  ;;  %1496 = vrsqrt.f32 %v2226_v4  ;;  %v2422_v61 = vand.u32 2147483647, %v2019_v21 }
  0xd0   : > { %v582_v16 = vadd.f32 0.04, %v578_v58  ;;  %v1185_v23 = vmax.f32 %v1181_v11, 0.001  ;;  %v2242_v50 = vmax.f32 %v1182_v10, 0.001  ;;  %v972_v45 = vmul.f32 %v1493_v56, %v2170_v38 }
  0xd1   : > { %v2240_v0 = vmax.f32 %v2422_v61, 0.001  ;;  %v729_v36 = vmin.f32 %v724_v5, 3.4028235e+38  ;;  %v1187_v40 = vmax.f32 %v1183_v19, 0.001  ;;  %v751_v35 = vrot.slane %v743_v63, %v1961_v47 }
  0xd2   : > { %v1495_v28 = vpop.eup %1494  ;;  %v588_v8 = vcombine.low %v581_v14, %v582_v16  ;;  %v2247_v60 = vsel %vm706_vm6, 1.0, %v1621_v57  ;;  %vm973_vm7 = vcmp.eq.f32.partialorder %v2170_v38, inf  ;;  %v877_v6 = vrot.slane %v2130_v44, 1 }
  0xd3   : > { %v726_v46 = vmul.f32 %v1495_v28, %v718_v27  ;;  %v1220_v51 = vmul.f32 4.0, %v2240_v0  ;;  %v884_v14 = vrot.slane %v2132_v62, 1  ;;  %v1221_v10 = vmul.f32 4.0, %v1185_v23 }
  0xd4   : > { %v602_v33 = vrot.slane %v588_v8, %v1961_v47  ;;  %v1222_v27 = vmul.f32 4.0, %v2242_v50  ;;  %v974_v5 = vsel %vm973_vm7, %v2170_v38, %v972_v45  ;;  %v1223_v56 = vmul.f32 4.0, %v1187_v40 }
  0xd5   : > { %v730_v58 = vmin.f32 %v726_v46, 3.4028235e+38  ;;  %vm975_vm8 = vcmp.eq.f32.partialorder %v2170_v38, 0.0  ;;  %v976_v16 = vand.u32 2147483648, %v2170_v38  ;;  %v891_v61 = vrot.slane %v2188_v55, 1 }
  0xd6   : > { %v603_v11 = vcombine.low %v595_v49, %v602_v33  ;;  %v898_v28 = vrot.slane %v897_v17, 1  ;;  %v2262_v49 = vmul.f32 %v2019_v21, %v2084_v32  ;;  %v878_v46 = vadd.f32 %v877_v6, %v2130_v44 }
  0xd7   : > { %v744_v19 = vcombine.low %v729_v36, %v730_v58  ;;  %v885_v36 = vadd.f32 %v884_v14, %v2132_v62  ;;  %v977_v45 = vsel %vm975_vm8, %v976_v16, %v974_v5  ;;  %v734_v38 = vmul.f32 3.1415927, %v2185_v26 }
  0xd8   : > { %v610_v63 = vrot.slane %v603_v11, %v1961_v47  ;;  %v737_v33 = vmul.f32 %v733_v15, %v2161_v34  ;;  %v800_v58 = vcombine.low %v2235_v7, %v2247_v60  ;;  %v978_v11 = vadd.f32 1.0, %v977_v45 }
  0xd9   : > { %v758_v8 = vrot.slane %v744_v19, %v1961_v47  ;;  %v1497_v21 = vpop.eup %1496  ;;  %v1224_v19 = vmul.f32 %v1220_v51, %v1956_v41  ;;  %v1225_v44 = vmul.f32 %v1221_v10, %v1958_v43  ;;  %v1226_v62 = vmul.f32 %v1222_v27, %v1969_v3 }
  0xda   : > { %1364 = vst.msk [vmem:[%s2012_s17 + $0x1] ss:$8 sm:$0xf] %vm1963_vm2, %v610_v63  ;;  %v1227_v6 = vmul.f32 %v1223_v56, %v1971_v52  ;;  %v892_v14 = vadd.f32 %v891_v61, %v2188_v55  ;;  %v899_v5 = vadd.f32 %v898_v28, %v897_v17  ;;  %1498 = vrcp.f32 %v978_v11 }
  0xdb   : > { %v759_v32 = vcombine.low %v751_v35, %v758_v8  ;;  %v900_v15 = vmul.f32 %v878_v46, %v1939_v9  ;;  %v901_v16 = vmul.f32 %v885_v36, %v1941_v13  ;;  %v1110_v35 = vmul.f32 %v1497_v21, %v2226_v4 }
  0xdc   : > { %vm1111_vm9 = vcmp.eq.f32.partialorder %v2226_v4, inf  ;;  %vm1113_vm10 = vcmp.eq.f32.partialorder %v2226_v4, 0.0  ;;  %v1114_v41 = vand.u32 2147483648, %v2226_v4  ;;  %v1192_v43 = vcombine.low %v2240_v0, %v1185_v23 }
  0xdd   : > { %v766_v34 = vrot.slane %v759_v32, %v1961_v47  ;;  %1500 = vrcp.f32 %v1224_v19  ;;  %v1112_v52 = vsel %vm1111_vm9, %v2226_v4, %v1110_v35  ;;  %v1193_v55 = vcombine.low %v2242_v50, %v1187_v40 }
  0xde   : > { %v902_v9 = vmul.f32 %v892_v14, %v1943_v20  ;;  %v903_v13 = vmul.f32 %v899_v5, %v1948_v24  ;;  %v1115_v17 = vsel %vm1113_vm10, %v1114_v41, %v1112_v52  ;;  %v1200_v51 = vrot.slane %v1192_v43, %v1961_v47 }
  0xdf   : > { %v768_v3 = vadd.f32 %v766_v34, %v2121_v42  ;;  %1502 = vrcp.f32 %v1225_v44  ;;  %v1116_v27 = vadd.f32 1.0, %v1115_v17  ;;  %v1207_v56 = vrot.slane %v1193_v55, %v1961_v47 }
  0xe0   : > { %v738_v0 = vmul.f32 %v734_v38, %v2185_v26  ;;  %1504 = vrcp.f32 %v1226_v62  ;;  %vm904_vm11 = vcmp.gt.f32.partialorder %v900_v15, 0.0  ;;  %vm905_vm12 = vcmp.gt.f32.partialorder %v901_v16, 0.0 }
  0xe1   : > { %v769_v10 = vmul.f32 %v768_v3, %v768_v3  ;;  %vm906_vm13 = vcmp.gt.f32.partialorder %v902_v9, 0.0  ;;  %vm907_vm14 = vcmp.gt.f32.partialorder %v903_v13, 0.0  ;;  %1506 = vrcp.f32 %v1116_v27 }
  0xe2   : > { %v1208_v50 = vcombine.low %v1200_v51, %v1207_v56  ;;  %1508 = vrcp.f32 %v1227_v6  ;;  %v908_v8 = vsel %vm904_vm11, 1.0, %v1621_v57  ;;  %v909_v46 = vsel %vm905_vm12, 1.0, %v1621_v57 }
  0xe3   : > { %v774_v4 = vrot.slane %v769_v10, %v2042_v12  ;;  %v778_v23 = vrot.slane %v769_v10, %v2071_v18  ;;  %v782_v20 = vrot.slane %v769_v10, %v2106_v54  ;;  %v786_v24 = vrot.slane %v769_v10, %v2113_v29 }
  0xe4   : > { %v1499_v61 = vpop.eup %1498  ;;  %v1215_v36 = vrot.slane %v1208_v50, %v1961_v47  ;;  %v910_v45 = vsel %vm906_vm13, 1.0, %v1621_v57  ;;  %v1041_v21 = vmul.f32 %v2087_v1, %v2173_v30  ;;  %vm1042_vm15 = vcmp.gt.f32.partialorder %v2262_v49, 0.0 }
  0xe5   : > { %v791_v40 = vmul.f32 %v774_v4, %v2207_v37  ;;  %v792_v63 = vmul.f32 %v778_v23, %v2211_v53  ;;  %v793_v26 = vmul.f32 %v782_v20, %v737_v33  ;;  %v794_v28 = vmul.f32 %v786_v24, %v738_v0  ;;  %v2423_v33 = vld [vmem:[#allocation8_spill] sm:$0xff] }
  0xe6   : > { %v911_v37 = vsel %vm907_vm14, 1.0, %v1621_v57  ;;  %v980_v38 = vmul.f32 2.0, %v1499_v61  ;;  %v1039_v53 = vmul.f32 %v2058_v39, %v2103_v31  ;;  %v1040_v11 = vmul.f32 %v2066_v59, %v2423_v33  ;;  %1376 = vst.msk [vmem:[%s2012_s17 + $0x4] ss:$8 sm:$0xf] %vm1963_vm2, %v1215_v36 }
  0xe7   : > { %1510 = vrcp.f32 %v791_v40  ;;  %v1501_v32 = vpop.eup %1500  ;;  %v807_v39 = vrot.slane %v799_v22, %v1961_v47  ;;  %v814_v31 = vrot.slane %v800_v58, %v1961_v47  ;;  %vm1045_vm3 = vcmp.gt.f32.partialorder %v1041_v21, 0.0 }
  0xe8   : > { %1512 = vrcp.f32 %v792_v63  ;;  %v985_v19 = vrot.slane %v980_v38, %v2042_v12  ;;  %v989_v44 = vrot.slane %v980_v38, %v2071_v18  ;;  %v993_v62 = vrot.slane %v980_v38, %v2106_v54 }
  0xe9   : > { %1514 = vrcp.f32 %v793_v26  ;;  %v997_v59 = vrot.slane %v980_v38, %v2113_v29  ;;  %v1503_v1 = vpop.eup %1502  ;;  %vm1043_vm0 = vcmp.gt.f32.partialorder %v1039_v53, 0.0  ;;  %vm1044_vm1 = vcmp.gt.f32.partialorder %v1040_v11, 0.0 }
  0xea   : > { %1516 = vrcp.f32 %v794_v28  ;;  %v1002_v30 = vmul.f32 %v985_v19, %v908_v8  ;;  %v1003_v6 = vmul.f32 %v989_v44, %v909_v46  ;;  %v1004_v14 = vmul.f32 %v993_v62, %v910_v45  ;;  %v1505_v5 = vpop.eup %1504 }
  0xeb   : > { %v1005_v34 = vmul.f32 %v997_v59, %v911_v37  ;;  %v1507_v2 = vpop.eup %1506  ;;  %v815_v22 = vcombine.low %v807_v39, %v814_v31  ;;  %v1046_v16 = vsel %vm1042_vm15, 1.0, %v1621_v57  ;;  %v1047_v35 = vsel %vm1043_vm0, 1.0, %v1621_v57 }
  0xec   : > { %v1509_v25 = vpop.eup %1508  ;;  %v1118_v15 = vmul.f32 2.0, %v1507_v2  ;;  %v1048_v7 = vsel %vm1044_vm1, 1.0, %v1621_v57  ;;  %v1049_v60 = vsel %vm1045_vm3, 1.0, %v1621_v57 }
  0xed   : > { %v822_v27 = vrot.slane %v815_v22, %v1961_v47  ;;  %v1238_v20 = vcombine.low %v1505_v5, %v1509_v25 }
  0xee   : > { %v1123_v41 = vrot.slane %v1118_v15, %v2042_v12  ;;  %v1127_v49 = vrot.slane %v1118_v15, %v2071_v18  ;;  %v1131_v43 = vrot.slane %v1118_v15, %v2106_v54  ;;  %v1135_v3 = vrot.slane %v1118_v15, %v2113_v29 }
  0xef   : > { %v1237_v29 = vcombine.low %v1501_v32, %v1503_v1  ;;  %v824_v40 = vmul.f32 %v822_v27, %v2121_v42  ;;  %v1252_v46 = vrot.slane %v1238_v20, %v1961_v47 }
  0xf0   : > { %v1140_v13 = vmul.f32 %v1123_v41, %v1046_v16  ;;  %v1141_v17 = vmul.f32 %v1127_v49, %v1047_v35  ;;  %v1142_v51 = vmul.f32 %v1131_v43, %v1048_v7  ;;  %v1143_v56 = vmul.f32 %v1135_v3, %v1049_v60 }
  0xf1   : > { %v1511_v58 = vpop.eup %1510  ;;  %v1245_v8 = vrot.slane %v1237_v29, %v1961_v47 }
  0xf2   : > { %v1513_v52 = vpop.eup %1512  ;;  %v1144_v12 = vmul.f32 %v1140_v13, %v1002_v30  ;;  %v1145_v4 = vmul.f32 %v1141_v17, %v1003_v6  ;;  %v1146_v18 = vmul.f32 %v1142_v51, %v1004_v14  ;;  %v1147_v23 = vmul.f32 %v1143_v56, %v1005_v34 }
  0xf3   : > { %v1515_v55 = vpop.eup %1514  ;;  %v833_v9 = vcombine.low %v1511_v58, %v1513_v52  ;;  %v1253_v42 = vcombine.low %v1245_v8, %v1252_v46 }
  0xf4   : > { %v1517_v10 = vpop.eup %1516  ;;  %v1152_v24 = vcombine.low %v1144_v12, %v1145_v4  ;;  %v1153_v50 = vcombine.low %v1146_v18, %v1147_v23 }
  0xf5   : > { %v834_v57 = vcombine.low %v1515_v55, %v1517_v10  ;;  %v841_v0 = vrot.slane %v833_v9, %v1961_v47  ;;  %v1260_v33 = vrot.slane %v1253_v42, %v1961_v47 }
  0xf6   : > { %v1160_v26 = vrot.slane %v1152_v24, %v1961_v47  ;;  %v1167_v61 = vrot.slane %v1153_v50, %v1961_v47 }
  0xf7   : > { %v848_v54 = vrot.slane %v834_v57, %v1961_v47 }
  0xf8   : > { %v1168_v36 = vcombine.low %v1160_v26, %v1167_v61 }
  0xf9   : > { %v849_v63 = vcombine.low %v841_v0, %v848_v54 }
  0xfa   : > { %v1175_v37 = vrot.slane %v1168_v36, %v1961_v47 }
  0xfb   : > { %v856_v28 = vrot.slane %v849_v63, %v1961_v47 }
  0xfc   : > { %1375 = vst.msk [vmem:[%s2012_s17 + $0x2] ss:$8 sm:$0xf] %vm1963_vm2, %v1175_v37 }
  0xfd   : > { %v858_v45 = vmul.f32 %v856_v28, %v824_v40 }
  0xff   : > { %vm859_vm4 = vcmp.ne.f32.partialorder %v858_v45, %v858_v45 }
 0x100   : > { %v860_v38 = vsel %vm859_vm4, 0.0, %v858_v45 }
 0x101   : > { %vm861_vm5 = vcmp.eq.f32.partialorder %v860_v38, inf }
 0x102   : > { %v862_v53 = vsel %vm861_vm5, 3.4028235e+38, %v860_v38 }
 0x103   : > { %vm863_vm6 = vcmp.eq.f32.partialorder %v862_v53, -inf }
 0x104   : > { %v864_v11 = vsel %vm863_vm6, -3.4028235e+38, %v862_v53 }
 0x105   : > { %1366 = vst.msk [vmem:[%s2012_s17 + $0x3] ss:$8 sm:$0xf] %vm1963_vm2, %v864_v11  ;;  %v1228_v21 = vmul.f32 0.04, %v864_v11 }
 0x107   : > { %v1262_v32 = vmul.f32 %v1260_v33, %v1228_v21 }
 0x109   : > { %v1263_v19 = vmin.f32 %v1262_v32, 3.4028235e+38 }
 0x10b   : > { %1264 = vst.msk [vmem:[%s2012_s17] ss:$8 sm:$0xf] %vm1963_vm2, %v1263_v19 }
 0x10c   : > { %1561 = shalt.err (!%p1558_p2)
}
 0x10d   : > { %s1562_s14 = scalar_lea.hbm %s2360_s3, 1024  ;;  %s1566_s21 = scalar_lea.hbm %s2409_s1, 4096 }
 0x10e   : > { %p1563_p4 = scmp.ne.s32.totalorder %s2360_s3, %s1562_s14  ;;  %p1567_p13 = scmp.lt.u32.totalorder %s2360_s3, %s2409_s1 }
 0x10f   : > { %p1568_p1 = scmp.lt.u32.totalorder %s1566_s21, %s1562_s14  ;;  %p1570_p6 = scmp.lt.u32.totalorder %s1562_s14, %s2360_s3 }
 0x110   : > { %p1564_p5 = pnand %p1563_p4, %p2424_p10 }
 0x111   : > { %p1569_p3 = por %p1568_p1, %p1567_p13 }
 0x112   : > { %p1565_p7 = pneg %p1564_p5 }
 0x113   : > { %p1571_p11 = por %p1570_p6, %p1569_p3 }
 0x115   : > { %p1572_p12 = pnand %p1571_p11, %p1565_p7 }
 0x117   : > { %1575 = shalt.err (!%p1572_p12)
}
 0x118   : > { %s1623_s26 = smov 512   ;;  %s1624_s30 = smov 2048  }
 0x119   : > { %s1625_s2 = smov 32  }
 0x11a   : > { %1386 = dma.vmem_to_hbm [thread:$0]  (%p2424_p10), %s2362_s27, 1024, %s2360_s3, %s1267_s10, %s1623_s26, %s1624_s30, %s1625_s2  }
 0x11b PF: > { %p1397_p8 = scmp.ge.s32.totalorder %s1614_s9, 2  ;;  %s1295_s17 = sand.u32 1, %s1602_s6  }
 0x11c   : > { %p2425_p9 = scmp.ne.s32.totalorder %s2415_s19, 0  ;;  %s1296_s25 = scalar_lea.sflag [#allocation4], %s1295_s17 }
 0x11e   : > { %p1393_p0 = pnand %p1397_p8, %p2425_p9 }
 0x120   : > { %1597 = dma.done.wait (!%p1393_p0), %s1296_s25, 1024  }
 0x121   : > { %1599 = vsyncadd (!%p1393_p0), %s1296_s25, 4294966272  ;;  %p14_p2 = scmp.ge.s32.totalorder %s1661_s12, 6   ;;  %s2426_s6 = smov %s1606_s7 }
 0x122   : > { %s2427_s7 = smov %s1610_s8  ;;  %s2428_s8 = smov %s1673_s15 }
 0x123   : > { %s2429_s9 = smov %s1661_s12  ;;  %16 = sbr.rel (!%p14_p2) target bundleno = 5 (0x5), region = 76 }
 0x12a   :  { %1301 = vsyncpa [#allocation3], 1 }
 0x12b   :  { %1303 = vsyncpa [#allocation3 + $0x1], 1 }
 0x12c   :  { %1304 = vsyncpa [#allocation4], 1 }
 0x12d   :  { %1306 = vsyncpa [#allocation4 + $0x1], 1 }

</bundles_post_ra>
